<compile_context>
chip_gen: v7x
topology: tpu7x:2x2x1
jax: 0.10.0
libtpu: 0.0.40
codegen_flags: <defaults>
</compile_context>

<pallas_src>
import jax
import jax.numpy as jnp
import numpy as np
from jax.experimental import pallas as pl
from jax.experimental.pallas import tpu as pltpu

HIGHEST = jax.lax.Precision.HIGHEST


# ----------------------------------------------------------------------------
# helpers
# ----------------------------------------------------------------------------
def nearest_idx(out_size, in_size):
    # PyTorch mode='nearest': src = floor(dst * in / out)  (exact int math)
    return (np.arange(out_size) * in_size) // out_size


def _gate_constants(C, D, H, W, M):
    """Static selection / pooling-weight matrices.  Each nearest up/down-sample
    and each layout move is a tiny matmul against one of these, so the kernel
    never needs reshape / concat / transpose."""
    HW, CD, DC = H * W, C * D, 3 * C
    idx_up_d = nearest_idx(M, D)
    idx_up_h = nearest_idx(M, H)
    idx_up_w = nearest_idx(M, W)
    dn_d, dn_h, dn_w = nearest_idx(D, M), nearest_idx(H, M), nearest_idx(W, M)
    wD = (np.bincount(idx_up_d, minlength=D) / float(M)).astype(np.float32)
    wH = (np.bincount(idx_up_h, minlength=H) / float(M)).astype(np.float32)
    wW = (np.bincount(idx_up_w, minlength=W) / float(M)).astype(np.float32)

    # poolw column 0  : mean over upsampled (H',W')    -> "d/w branch" pool
    # poolw columns 1.. : H-weighted W-gather to len M -> "h branch" partial pool
    whw_col = (wH[:, None] * wW[None, :]).reshape(HW, 1)
    up_w_mat = np.zeros((W, M), np.float32)
    up_w_mat[idx_up_w, np.arange(M)] = 1.0                       # [w == idx_up_w[m]]
    swm = (wH[:, None, None] * up_w_mat[None, :, :]).reshape(HW, M)
    poolw = np.concatenate([whw_col, swm], axis=1)               # (HW, 1+M)

    eyeC = np.eye(C, dtype=np.float32)
    l0 = np.kron(eyeC, np.ones((1, D), np.float32))              # (C, CD) group pick
    lw = np.kron(eyeC, wD.reshape(1, D))                         # (C, CD) D-weighted sum
    lt = np.kron(eyeC, np.ones((D, 1), np.float32))              # (CD, C) replicate over d

    dsel = np.tile((np.arange(D)[:, None] == idx_up_d[None, :])  # (CD, M) D -> M upsample
                   .astype(np.float32), (C, 1))
    msel = np.tile((dn_d[:, None] == np.arange(M)[None, :])      # (CD, M) M -> D gather
                   .astype(np.float32), (C, 1))

    pdm = np.zeros((DC, C), np.float32)                          # xcat = [d ; h ; d]
    pdm[0:C] = eyeC
    pdm[2 * C:3 * C] = eyeC
    phm = np.zeros((DC, C), np.float32)
    phm[C:2 * C] = eyeC

    srm = np.eye(M, k=1, dtype=np.float32)                       # (x@srm)[:, m] = x[:, m-1]
    slm = np.eye(M, k=-1, dtype=np.float32)                      # (x@slm)[:, m] = x[:, m+1]

    gh_t = np.zeros((M, H), np.float32)
    gh_t[dn_h, np.arange(H)] = 1.0                               # [m == dn_h[h]]
    ghm = np.repeat(gh_t[:, :, None], W, axis=2).reshape(M, HW)
    gw_t = np.zeros((M, W), np.float32)
    gw_t[dn_w, np.arange(W)] = 1.0                               # [m == dn_w[w]]
    gwm = np.repeat(gw_t[:, None, :], H, axis=1).reshape(M, HW)

    return poolw, l0, dsel, lw, pdm, phm, srm, slm, lt, msel, ghm, gwm


# ----------------------------------------------------------------------------
# Fused kernel: one grid step per batch element.
#   x block: (1, C*D, H*W) bf16 (lane-dense).  Everything else is a tiny
#   broadcast operand.  All math is 2-D; f32 accumulation throughout.
# ----------------------------------------------------------------------------
def fused_kernel(x_ref, poolw_ref, l0_ref, dsel_ref, lw_ref, pd_ref, ph_ref,
                 sr_ref, sl_ref, dww_ref, bns_ref, bnb_ref, sew_ref, seb_ref,
                 pjwd_ref, pjwh_ref, pjww_ref, pjbd_ref, pjbh_ref, pjbw_ref,
                 lt_ref, msel_ref, gh_ref, gw_ref, o_ref):
    M = sr_ref.shape[0]
    x2 = x_ref[0]                                                 # (CD, HW) bf16

    # ---- both adaptive pools as one bf16 MXU dot over the lane axis --------
    pool = jnp.dot(x2, poolw_ref[...],
                   preferred_element_type=jnp.float32)            # (CD, 1+M)
    dvec = pool[:, 0:1]                                           # (CD, 1)  d/w pool
    hmat = pool[:, 1:1 + M]                                       # (CD, M)  h pool (pre D-sum)

    # ---- per-channel pooled rows, nearest-upsampled to length M ------------
    # (0/1 gather matmuls kept at HIGHEST so they are exact copies; cost ~0)
    d_up = jnp.dot(l0_ref[...], dvec * dsel_ref[...],
                   precision=HIGHEST, preferred_element_type=jnp.float32)   # (C, M)
    h_up = jnp.dot(lw_ref[...], hmat,
                   precision=HIGHEST, preferred_element_type=jnp.float32)   # (C, M)
    # xcat = [d ; h ; d]  (torch's third pooled branch equals the first)
    xcat = (jnp.dot(pd_ref[...], d_up, precision=HIGHEST,
                    preferred_element_type=jnp.float32)
            + jnp.dot(ph_ref[...], h_up, precision=HIGHEST,
                      preferred_element_type=jnp.float32))        # (3C, M)

    # ---- depthwise conv1d k=3 with zero 'same' padding (shift matrices) ----
    xm1 = jnp.dot(xcat, sr_ref[...], precision=HIGHEST,
                  preferred_element_type=jnp.float32)             # xcat[:, m-1]
    xp1 = jnp.dot(xcat, sl_ref[...], precision=HIGHEST,
                  preferred_element_type=jnp.float32)             # xcat[:, m+1]
    w3 = dww_ref[...]
    y = w3[:, 0:1] * xm1 + w3[:, 1:2] * xcat + w3[:, 2:3] * xp1

    # ---- BN (inference) + ReLU + SE reduce + ReLU + project + sigmoid ------
    y = jnp.maximum(y * bns_ref[...] + bnb_ref[...], 0.0)
    s = jnp.maximum(jnp.dot(sew_ref[...], y,
                            preferred_element_type=jnp.float32)
                    + seb_ref[...], 0.0)                          # (SE, M)
    dg = jax.nn.sigmoid(jnp.dot(pjwd_ref[...], s,
                                preferred_element_type=jnp.float32)
                        + pjbd_ref[...])                          # (C, M)
    hg = jax.nn.sigmoid(jnp.dot(pjwh_ref[...], s,
                                preferred_element_type=jnp.float32)
                        + pjbh_ref[...])
    wg = jax.nn.sigmoid(jnp.dot(pjww_ref[...], s,
                                preferred_element_type=jnp.float32)
                        + pjbw_ref[...])

    # ---- gates back to x-layout: (CD,1) sublane column + (CD,HW) lane mask -
    dgrow = jnp.sum(jnp.dot(lt_ref[...], dg, precision=HIGHEST,
                            preferred_element_type=jnp.float32)
                    * msel_ref[...], axis=1, keepdims=True)       # (CD, 1)
    maskc = (jnp.dot(hg, gh_ref[...], precision=HIGHEST,
                     preferred_element_type=jnp.float32)
             * jnp.dot(wg, gw_ref[...], precision=HIGHEST,
                       preferred_element_type=jnp.float32))       # (C, HW)
    mask_hw = jnp.dot(lt_ref[...], maskc, precision=HIGHEST,
                      preferred_element_type=jnp.float32)         # (CD, HW)

    # ---- apply: out = x * d_gate (x) (h_gate * w_gate) ----------------------
    o_ref[0] = (x2 * dgrow * mask_hw).astype(o_ref.dtype)


# ----------------------------------------------------------------------------
# Forward pass: one fused pallas_call per forward; glue is layout-free.
# ----------------------------------------------------------------------------
def attention3d_up_forward(x, params):
    B, C, D, H, W = x.shape
    M = max(D, H, W)
    CD, HW = C * D, H * W
    out_dtype = x.dtype

    # Lane-dense layout (free reshape): rows = (c, d), lanes = (h, w).
    x2 = x.reshape(B, CD, HW)
    if x2.dtype != jnp.bfloat16:
        # Mem-bound kernel: halve the HBM read.  In a real model feed bf16
        # activations directly so this cast fuses into the producer.
        x2 = x2.astype(jnp.bfloat16)

    (poolw, l0, dsel, lw, pdm, phm, srm, slm, lt, msel, ghm, gwm) = \
        _gate_constants(C, D, H, W, M)

    pjw, pjb = params["pjw"], params["pjb"]
    operands = [
        x2,
        jnp.asarray(poolw, jnp.bfloat16),   # bf16 weights feed the bf16 MXU pool dot
        jnp.asarray(l0), jnp.asarray(dsel), jnp.asarray(lw),
        jnp.asarray(pdm), jnp.asarray(phm), jnp.asarray(srm), jnp.asarray(slm),
        params["dww"], params["bn_scale"], params["bn_bias"],
        params["sew"], params["seb"],
        pjw[:C], pjw[C:2 * C], pjw[2 * C:3 * C],
        pjb[:C], pjb[C:2 * C], pjb[2 * C:3 * C],
        jnp.asarray(lt), jnp.asarray(msel), jnp.asarray(ghm), jnp.asarray(gwm),
    ]
    in_specs = ([pl.BlockSpec((1, CD, HW), lambda b: (b, 0, 0))]
                + [pl.BlockSpec(op.shape, lambda b: (0, 0))
                   for op in operands[1:]])

    out2 = pl.pallas_call(
        fused_kernel,
        out_shape=jax.ShapeDtypeStruct((B, CD, HW), out_dtype),
        grid=(B,),
        in_specs=in_specs,
        out_specs=pl.BlockSpec((1, CD, HW), lambda b: (b, 0, 0)),
        compiler_params=pltpu.CompilerParams(
            dimension_semantics=("parallel",)),
    )(*operands)
    return out2.reshape(B, C, D, H, W)


# ----------------------------------------------------------------------------
# Pure-JAX reference (mirrors the PyTorch forward directly: materializes the
# upsampled cube, computes all three pools independently, BN in eval mode)
# ----------------------------------------------------------------------------
def reference_forward(x, params):
    B, C, D, H, W = x.shape
    M = max(D, H, W)
    u = jnp.take(x, nearest_idx(M, D), axis=2)
    u = jnp.take(u, nearest_idx(M, H), axis=3)
    u = jnp.take(u, nearest_idx(M, W), axis=4)
    d = jnp.mean(u, axis=(3, 4))                                   # keep D
    h = jnp.mean(jnp.transpose(u, (0, 1, 4, 3, 2)), axis=(3, 4))   # keep W
    w = jnp.mean(jnp.transpose(u, (0, 1, 2, 4, 3)), axis=(3, 4))   # keep D
    xcat = jnp.concatenate([d, h, w], axis=1)
    xp = jnp.pad(xcat, ((0, 0), (0, 0), (1, 1)))
    dww = params["dww"]
    y = (dww[None, :, 0:1] * xp[:, :, 0:M]
         + dww[None, :, 1:2] * xp[:, :, 1:M + 1]
         + dww[None, :, 2:3] * xp[:, :, 2:M + 2])
    y = y * params["bn_scale"][None, :, :] + params["bn_bias"][None, :, :]
    y = jnp.maximum(y, 0.0)
    s = jnp.einsum("sc,bcm->bsm", params["sew"], y,
                   precision=HIGHEST) + params["seb"][None, :, :]
    s = jnp.maximum(s, 0.0)
    g = jnp.einsum("cs,bsm->bcm", params["pjw"], s,
                   precision=HIGHEST) + params["pjb"][None, :, :]
    g = jax.nn.sigmoid(g)
    dg, hg, wg = g[:, :C], g[:, C:2 * C], g[:, 2 * C:]
    maskM = (dg[:, :, :, None, None] * hg[:, :, None, :, None]
             * wg[:, :, None, None, :])                            # (B,C,M,M,M)
    mask = jnp.take(maskM, nearest_idx(D, M), axis=2)
    mask = jnp.take(mask, nearest_idx(H, M), axis=3)
    mask = jnp.take(mask, nearest_idx(W, M), axis=4)
    return x * mask


# ----------------------------------------------------------------------------
# main
# ----------------------------------------------------------------------------
if __name__ == "__main__":
    B, C, D, H, W = 2, 4, 8, 16, 16
    kernel_size, reduction, bn_eps = 3, 48, 1e-3
    DC = C * 3
    SE = max(1, DC // reduction)

    key = jax.random.PRNGKey(0)
    ks = jax.random.split(key, 10)
    x = jax.random.normal(ks[0], (B, C, D, H, W), jnp.float32)

    # deterministic synthetic parameters (shapes from the module __init__)
    dww = jax.random.normal(ks[1], (DC, kernel_size), jnp.float32) * 0.3
    gamma = jax.random.uniform(ks[2], (DC,), jnp.float32, 0.5, 1.5)
    beta = jax.random.normal(ks[3], (DC,), jnp.float32) * 0.1
    rmean = jax.random.normal(ks[4], (DC,), jnp.float32) * 0.1
    rvar = jax.random.uniform(ks[5], (DC,), jnp.float32, 0.5, 1.5)
    sew = jax.random.normal(ks[6], (SE, DC), jnp.float32) * 0.3
    seb = jax.random.normal(ks[7], (SE,), jnp.float32) * 0.1
    pjw = jax.random.normal(ks[8], (DC, SE), jnp.float32) * 0.3
    pjb = jax.random.normal(ks[9], (DC,), jnp.float32) * 0.1

    bn_scale = gamma / jnp.sqrt(rvar + bn_eps)
    bn_bias = beta - rmean * bn_scale

    params = {
        "dww": dww,
        "bn_scale": bn_scale.reshape(DC, 1),
        "bn_bias": bn_bias.reshape(DC, 1),
        "sew": sew,
        "seb": seb.reshape(SE, 1),
        "pjw": pjw,
        "pjb": pjb.reshape(DC, 1),
    }

    fwd = jax.jit(attention3d_up_forward)
    out = jax.block_until_ready(fwd(x, params))

    # The kernel path deliberately rounds x to bf16 (perf-review item), so the
    # reference is evaluated on the same rounded input; the tolerance covers
    # the default-precision MXU dots in the (tiny) gate path.
    x_bf = x.astype(jnp.bfloat16).astype(jnp.float32)
    ref = jax.block_until_ready(reference_forward(x_bf, params))
    np.testing.assert_allclose(np.asarray(out), np.asarray(ref),
                               rtol=2e-2, atol=2e-2)
    assert out.shape == (B, C, D, H, W)
    print("KERNEL_OK")
</pallas_src>

<mosaic_0001>
module attributes {stable_mosaic.version = 11 : i64} {
  func.func @fused_kernel(%arg0: i32, %arg1: memref<1x32x256xbf16, #tpu.memory_space<vmem>>, %arg2: memref<256x17xbf16, #tpu.memory_space<vmem>>, %arg3: memref<4x32xf32, #tpu.memory_space<vmem>>, %arg4: memref<32x16xf32, #tpu.memory_space<vmem>>, %arg5: memref<4x32xf32, #tpu.memory_space<vmem>>, %arg6: memref<12x4xf32, #tpu.memory_space<vmem>>, %arg7: memref<12x4xf32, #tpu.memory_space<vmem>>, %arg8: memref<16x16xf32, #tpu.memory_space<vmem>>, %arg9: memref<16x16xf32, #tpu.memory_space<vmem>>, %arg10: memref<12x3xf32, #tpu.memory_space<vmem>>, %arg11: memref<12x1xf32, #tpu.memory_space<vmem>>, %arg12: memref<12x1xf32, #tpu.memory_space<vmem>>, %arg13: memref<1x12xf32, #tpu.memory_space<vmem>>, %arg14: memref<1x1xf32, #tpu.memory_space<vmem>>, %arg15: memref<4x1xf32, #tpu.memory_space<vmem>>, %arg16: memref<4x1xf32, #tpu.memory_space<vmem>>, %arg17: memref<4x1xf32, #tpu.memory_space<vmem>>, %arg18: memref<4x1xf32, #tpu.memory_space<vmem>>, %arg19: memref<4x1xf32, #tpu.memory_space<vmem>>, %arg20: memref<4x1xf32, #tpu.memory_space<vmem>>, %arg21: memref<32x4xf32, #tpu.memory_space<vmem>>, %arg22: memref<32x16xf32, #tpu.memory_space<vmem>>, %arg23: memref<16x256xf32, #tpu.memory_space<vmem>>, %arg24: memref<16x256xf32, #tpu.memory_space<vmem>>, %arg25: memref<1x32x256xf32, #tpu.memory_space<vmem>>) attributes {dimension_semantics = [#tpu.dimension_semantics<parallel>], iteration_bounds = array<i64: 2>, scalar_prefetch = 0 : i64, scratch_operands = 0 : i64, tpu.core_type = #tpu.core_type<tc>, window_params = [{transform_indices = @transform_0, window_bounds = array<i64: 1, 32, 256>}, {pipeline_mode = #tpu.pipeline_mode<synchronous>, transform_indices = @transform_1, window_bounds = array<i64: 256, 17>}, {pipeline_mode = #tpu.pipeline_mode<synchronous>, transform_indices = @transform_2, window_bounds = array<i64: 4, 32>}, {pipeline_mode = #tpu.pipeline_mode<synchronous>, transform_indices = @transform_3, window_bounds = array<i64: 32, 16>}, {pipeline_mode = #tpu.pipeline_mode<synchronous>, transform_indices = @transform_4, window_bounds = array<i64: 4, 32>}, {pipeline_mode = #tpu.pipeline_mode<synchronous>, transform_indices = @transform_5, window_bounds = array<i64: 12, 4>}, {pipeline_mode = #tpu.pipeline_mode<synchronous>, transform_indices = @transform_6, window_bounds = array<i64: 12, 4>}, {pipeline_mode = #tpu.pipeline_mode<synchronous>, transform_indices = @transform_7, window_bounds = array<i64: 16, 16>}, {pipeline_mode = #tpu.pipeline_mode<synchronous>, transform_indices = @transform_8, window_bounds = array<i64: 16, 16>}, {pipeline_mode = #tpu.pipeline_mode<synchronous>, transform_indices = @transform_9, window_bounds = array<i64: 12, 3>}, {pipeline_mode = #tpu.pipeline_mode<synchronous>, transform_indices = @transform_10, window_bounds = array<i64: 12, 1>}, {pipeline_mode = #tpu.pipeline_mode<synchronous>, transform_indices = @transform_11, window_bounds = array<i64: 12, 1>}, {pipeline_mode = #tpu.pipeline_mode<synchronous>, transform_indices = @transform_12, window_bounds = array<i64: 1, 12>}, {pipeline_mode = #tpu.pipeline_mode<synchronous>, transform_indices = @transform_13, window_bounds = array<i64: 1, 1>}, {pipeline_mode = #tpu.pipeline_mode<synchronous>, transform_indices = @transform_14, window_bounds = array<i64: 4, 1>}, {pipeline_mode = #tpu.pipeline_mode<synchronous>, transform_indices = @transform_15, window_bounds = array<i64: 4, 1>}, {pipeline_mode = #tpu.pipeline_mode<synchronous>, transform_indices = @transform_16, window_bounds = array<i64: 4, 1>}, {pipeline_mode = #tpu.pipeline_mode<synchronous>, transform_indices = @transform_17, window_bounds = array<i64: 4, 1>}, {pipeline_mode = #tpu.pipeline_mode<synchronous>, transform_indices = @transform_18, window_bounds = array<i64: 4, 1>}, {pipeline_mode = #tpu.pipeline_mode<synchronous>, transform_indices = @transform_19, window_bounds = array<i64: 4, 1>}, {pipeline_mode = #tpu.pipeline_mode<synchronous>, transform_indices = @transform_20, window_bounds = array<i64: 32, 4>}, {pipeline_mode = #tpu.pipeline_mode<synchronous>, transform_indices = @transform_21, window_bounds = array<i64: 32, 16>}, {pipeline_mode = #tpu.pipeline_mode<synchronous>, transform_indices = @transform_22, window_bounds = array<i64: 16, 256>}, {pipeline_mode = #tpu.pipeline_mode<synchronous>, transform_indices = @transform_23, window_bounds = array<i64: 16, 256>}, {transform_indices = @transform_24, window_bounds = array<i64: 1, 32, 256>}]} {
    %c0 = arith.constant 0 : index
    %c0_0 = arith.constant 0 : index
    %c0_1 = arith.constant 0 : index
    %0 = vector.load %arg1[%c0, %c0_0, %c0_1] : memref<1x32x256xbf16, #tpu.memory_space<vmem>>, vector<1x32x256xbf16>
    %1 = vector.shape_cast %0 : vector<1x32x256xbf16> to vector<32x256xbf16>
    %c0_2 = arith.constant 0 : index
    %c0_3 = arith.constant 0 : index
    %2 = vector.load %arg2[%c0_2, %c0_3] : memref<256x17xbf16, #tpu.memory_space<vmem>>, vector<256x17xbf16>
    %cst = arith.constant dense<0.000000e+00> : vector<32x17xf32>
    %3 = tpu.matmul %1, %2, %cst {dimension_numbers = #tpu.dot_dimension_numbers<[1], [0], [0], [1], [0, 0, 1, 1], [], []>} : vector<32x256xbf16>, vector<256x17xbf16>, vector<32x17xf32> -> vector<32x17xf32>
    %4 = vector.extract_strided_slice %3 {offsets = [0, 0], sizes = [32, 1], strides = [1, 1]} : vector<32x17xf32> to vector<32x1xf32>
    %5 = vector.extract_strided_slice %3 {offsets = [0, 1], sizes = [32, 16], strides = [1, 1]} : vector<32x17xf32> to vector<32x16xf32>
    %c0_4 = arith.constant 0 : index
    %c0_5 = arith.constant 0 : index
    %6 = vector.load %arg3[%c0_4, %c0_5] : memref<4x32xf32, #tpu.memory_space<vmem>>, vector<4x32xf32>
    %c0_6 = arith.constant 0 : index
    %c0_7 = arith.constant 0 : index
    %7 = vector.load %arg4[%c0_6, %c0_7] : memref<32x16xf32, #tpu.memory_space<vmem>>, vector<32x16xf32>
    %8 = vector.broadcast %4 : vector<32x1xf32> to vector<32x16xf32>
    %9 = arith.mulf %8, %7 : vector<32x16xf32>
    %cst_8 = arith.constant dense<0.000000e+00> : vector<4x16xf32>
    %10 = tpu.matmul %6, %9, %cst_8 {dimension_numbers = #tpu.dot_dimension_numbers<[1], [0], [0], [1], [0, 0, 1, 1], [], []>, precision = #tpu.contract_precision<fp32>} : vector<4x32xf32>, vector<32x16xf32>, vector<4x16xf32> -> vector<4x16xf32>
    %c0_9 = arith.constant 0 : index
    %c0_10 = arith.constant 0 : index
    %11 = vector.load %arg5[%c0_9, %c0_10] : memref<4x32xf32, #tpu.memory_space<vmem>>, vector<4x32xf32>
    %cst_11 = arith.constant dense<0.000000e+00> : vector<4x16xf32>
    %12 = tpu.matmul %11, %5, %cst_11 {dimension_numbers = #tpu.dot_dimension_numbers<[1], [0], [0], [1], [0, 0, 1, 1], [], []>, precision = #tpu.contract_precision<fp32>} : vector<4x32xf32>, vector<32x16xf32>, vector<4x16xf32> -> vector<4x16xf32>
    %c0_12 = arith.constant 0 : index
    %c0_13 = arith.constant 0 : index
    %13 = vector.load %arg6[%c0_12, %c0_13] : memref<12x4xf32, #tpu.memory_space<vmem>>, vector<12x4xf32>
    %cst_14 = arith.constant dense<0.000000e+00> : vector<12x16xf32>
    %14 = tpu.matmul %13, %10, %cst_14 {dimension_numbers = #tpu.dot_dimension_numbers<[1], [0], [0], [1], [0, 0, 1, 1], [], []>, precision = #tpu.contract_precision<fp32>} : vector<12x4xf32>, vector<4x16xf32>, vector<12x16xf32> -> vector<12x16xf32>
    %c0_15 = arith.constant 0 : index
    %c0_16 = arith.constant 0 : index
    %15 = vector.load %arg7[%c0_15, %c0_16] : memref<12x4xf32, #tpu.memory_space<vmem>>, vector<12x4xf32>
    %cst_17 = arith.constant dense<0.000000e+00> : vector<12x16xf32>
    %16 = tpu.matmul %15, %12, %cst_17 {dimension_numbers = #tpu.dot_dimension_numbers<[1], [0], [0], [1], [0, 0, 1, 1], [], []>, precision = #tpu.contract_precision<fp32>} : vector<12x4xf32>, vector<4x16xf32>, vector<12x16xf32> -> vector<12x16xf32>
    %17 = arith.addf %14, %16 : vector<12x16xf32>
    %c0_18 = arith.constant 0 : index
    %c0_19 = arith.constant 0 : index
    %18 = vector.load %arg8[%c0_18, %c0_19] : memref<16x16xf32, #tpu.memory_space<vmem>>, vector<16x16xf32>
    %cst_20 = arith.constant dense<0.000000e+00> : vector<12x16xf32>
    %19 = tpu.matmul %17, %18, %cst_20 {dimension_numbers = #tpu.dot_dimension_numbers<[1], [0], [0], [1], [0, 0, 1, 1], [], []>, precision = #tpu.contract_precision<fp32>} : vector<12x16xf32>, vector<16x16xf32>, vector<12x16xf32> -> vector<12x16xf32>
    %c0_21 = arith.constant 0 : index
    %c0_22 = arith.constant 0 : index
    %20 = vector.load %arg9[%c0_21, %c0_22] : memref<16x16xf32, #tpu.memory_space<vmem>>, vector<16x16xf32>
    %cst_23 = arith.constant dense<0.000000e+00> : vector<12x16xf32>
    %21 = tpu.matmul %17, %20, %cst_23 {dimension_numbers = #tpu.dot_dimension_numbers<[1], [0], [0], [1], [0, 0, 1, 1], [], []>, precision = #tpu.contract_precision<fp32>} : vector<12x16xf32>, vector<16x16xf32>, vector<12x16xf32> -> vector<12x16xf32>
    %c0_24 = arith.constant 0 : index
    %c0_25 = arith.constant 0 : index
    %22 = vector.load %arg10[%c0_24, %c0_25] : memref<12x3xf32, #tpu.memory_space<vmem>>, vector<12x3xf32>
    %23 = vector.extract_strided_slice %22 {offsets = [0, 0], sizes = [12, 1], strides = [1, 1]} : vector<12x3xf32> to vector<12x1xf32>
    %24 = vector.broadcast %23 : vector<12x1xf32> to vector<12x16xf32>
    %25 = arith.mulf %24, %19 : vector<12x16xf32>
    %26 = vector.extract_strided_slice %22 {offsets = [0, 1], sizes = [12, 1], strides = [1, 1]} : vector<12x3xf32> to vector<12x1xf32>
    %27 = vector.broadcast %26 : vector<12x1xf32> to vector<12x16xf32>
    %28 = arith.mulf %27, %17 : vector<12x16xf32>
    %29 = arith.addf %25, %28 : vector<12x16xf32>
    %30 = vector.extract_strided_slice %22 {offsets = [0, 2], sizes = [12, 1], strides = [1, 1]} : vector<12x3xf32> to vector<12x1xf32>
    %31 = vector.broadcast %30 : vector<12x1xf32> to vector<12x16xf32>
    %32 = arith.mulf %31, %21 : vector<12x16xf32>
    %33 = arith.addf %29, %32 : vector<12x16xf32>
    %c0_26 = arith.constant 0 : index
    %c0_27 = arith.constant 0 : index
    %34 = vector.load %arg11[%c0_26, %c0_27] : memref<12x1xf32, #tpu.memory_space<vmem>>, vector<12x1xf32>
    %35 = vector.broadcast %34 : vector<12x1xf32> to vector<12x16xf32>
    %36 = arith.mulf %33, %35 : vector<12x16xf32>
    %c0_28 = arith.constant 0 : index
    %c0_29 = arith.constant 0 : index
    %37 = vector.load %arg12[%c0_28, %c0_29] : memref<12x1xf32, #tpu.memory_space<vmem>>, vector<12x1xf32>
    %38 = vector.broadcast %37 : vector<12x1xf32> to vector<12x16xf32>
    %39 = arith.addf %36, %38 : vector<12x16xf32>
    %cst_30 = arith.constant 0.000000e+00 : f32
    %40 = vector.broadcast %cst_30 : f32 to vector<12x16xf32>
    %41 = arith.maximumf %39, %40 : vector<12x16xf32>
    %c0_31 = arith.constant 0 : index
    %c0_32 = arith.constant 0 : index
    %42 = vector.load %arg13[%c0_31, %c0_32] : memref<1x12xf32, #tpu.memory_space<vmem>>, vector<1x12xf32>
    %cst_33 = arith.constant dense<0.000000e+00> : vector<1x16xf32>
    %43 = tpu.matmul %42, %41, %cst_33 {dimension_numbers = #tpu.dot_dimension_numbers<[1], [0], [0], [1], [0, 0, 1, 1], [], []>} : vector<1x12xf32>, vector<12x16xf32>, vector<1x16xf32> -> vector<1x16xf32>
    %c0_34 = arith.constant 0 : index
    %c0_35 = arith.constant 0 : index
    %44 = vector.load %arg14[%c0_34, %c0_35] : memref<1x1xf32, #tpu.memory_space<vmem>>, vector<1x1xf32>
    %45 = vector.broadcast %44 : vector<1x1xf32> to vector<1x16xf32>
    %46 = arith.addf %43, %45 : vector<1x16xf32>
    %cst_36 = arith.constant 0.000000e+00 : f32
    %47 = vector.broadcast %cst_36 : f32 to vector<1x16xf32>
    %48 = arith.maximumf %46, %47 : vector<1x16xf32>
    %c0_37 = arith.constant 0 : index
    %c0_38 = arith.constant 0 : index
    %49 = vector.load %arg15[%c0_37, %c0_38] : memref<4x1xf32, #tpu.memory_space<vmem>>, vector<4x1xf32>
    %cst_39 = arith.constant dense<0.000000e+00> : vector<4x16xf32>
    %50 = tpu.matmul %49, %48, %cst_39 {dimension_numbers = #tpu.dot_dimension_numbers<[1], [0], [0], [1], [0, 0, 1, 1], [], []>} : vector<4x1xf32>, vector<1x16xf32>, vector<4x16xf32> -> vector<4x16xf32>
    %c0_40 = arith.constant 0 : index
    %c0_41 = arith.constant 0 : index
    %51 = vector.load %arg18[%c0_40, %c0_41] : memref<4x1xf32, #tpu.memory_space<vmem>>, vector<4x1xf32>
    %52 = vector.broadcast %51 : vector<4x1xf32> to vector<4x16xf32>
    %53 = arith.addf %50, %52 : vector<4x16xf32>
    %54 = arith.negf %53 : vector<4x16xf32>
    %55 = math.exp %54 : vector<4x16xf32>
    %cst_42 = arith.constant 1.000000e+00 : f32
    %56 = vector.broadcast %cst_42 : f32 to vector<4x16xf32>
    %57 = arith.addf %56, %55 : vector<4x16xf32>
    %58 = arith.divf %56, %57 : vector<4x16xf32>
    %c0_43 = arith.constant 0 : index
    %c0_44 = arith.constant 0 : index
    %59 = vector.load %arg16[%c0_43, %c0_44] : memref<4x1xf32, #tpu.memory_space<vmem>>, vector<4x1xf32>
    %cst_45 = arith.constant dense<0.000000e+00> : vector<4x16xf32>
    %60 = tpu.matmul %59, %48, %cst_45 {dimension_numbers = #tpu.dot_dimension_numbers<[1], [0], [0], [1], [0, 0, 1, 1], [], []>} : vector<4x1xf32>, vector<1x16xf32>, vector<4x16xf32> -> vector<4x16xf32>
    %c0_46 = arith.constant 0 : index
    %c0_47 = arith.constant 0 : index
    %61 = vector.load %arg19[%c0_46, %c0_47] : memref<4x1xf32, #tpu.memory_space<vmem>>, vector<4x1xf32>
    %62 = vector.broadcast %61 : vector<4x1xf32> to vector<4x16xf32>
    %63 = arith.addf %60, %62 : vector<4x16xf32>
    %64 = arith.negf %63 : vector<4x16xf32>
    %65 = math.exp %64 : vector<4x16xf32>
    %cst_48 = arith.constant 1.000000e+00 : f32
    %66 = vector.broadcast %cst_48 : f32 to vector<4x16xf32>
    %67 = arith.addf %66, %65 : vector<4x16xf32>
    %68 = arith.divf %66, %67 : vector<4x16xf32>
    %c0_49 = arith.constant 0 : index
    %c0_50 = arith.constant 0 : index
    %69 = vector.load %arg17[%c0_49, %c0_50] : memref<4x1xf32, #tpu.memory_space<vmem>>, vector<4x1xf32>
    %cst_51 = arith.constant dense<0.000000e+00> : vector<4x16xf32>
    %70 = tpu.matmul %69, %48, %cst_51 {dimension_numbers = #tpu.dot_dimension_numbers<[1], [0], [0], [1], [0, 0, 1, 1], [], []>} : vector<4x1xf32>, vector<1x16xf32>, vector<4x16xf32> -> vector<4x16xf32>
    %c0_52 = arith.constant 0 : index
    %c0_53 = arith.constant 0 : index
    %71 = vector.load %arg20[%c0_52, %c0_53] : memref<4x1xf32, #tpu.memory_space<vmem>>, vector<4x1xf32>
    %72 = vector.broadcast %71 : vector<4x1xf32> to vector<4x16xf32>
    %73 = arith.addf %70, %72 : vector<4x16xf32>
    %74 = arith.negf %73 : vector<4x16xf32>
    %75 = math.exp %74 : vector<4x16xf32>
    %cst_54 = arith.constant 1.000000e+00 : f32
    %76 = vector.broadcast %cst_54 : f32 to vector<4x16xf32>
    %77 = arith.addf %76, %75 : vector<4x16xf32>
    %78 = arith.divf %76, %77 : vector<4x16xf32>
    %c0_55 = arith.constant 0 : index
    %c0_56 = arith.constant 0 : index
    %79 = vector.load %arg21[%c0_55, %c0_56] : memref<32x4xf32, #tpu.memory_space<vmem>>, vector<32x4xf32>
    %cst_57 = arith.constant dense<0.000000e+00> : vector<32x16xf32>
    %80 = tpu.matmul %79, %58, %cst_57 {dimension_numbers = #tpu.dot_dimension_numbers<[1], [0], [0], [1], [0, 0, 1, 1], [], []>, precision = #tpu.contract_precision<fp32>} : vector<32x4xf32>, vector<4x16xf32>, vector<32x16xf32> -> vector<32x16xf32>
    %c0_58 = arith.constant 0 : index
    %c0_59 = arith.constant 0 : index
    %81 = vector.load %arg22[%c0_58, %c0_59] : memref<32x16xf32, #tpu.memory_space<vmem>>, vector<32x16xf32>
    %82 = arith.mulf %80, %81 : vector<32x16xf32>
    %cst_60 = arith.constant dense<0.000000e+00> : vector<32xf32>
    %83 = vector.multi_reduction <add>, %82, %cst_60 [1] : vector<32x16xf32> to vector<32xf32>
    %84 = vector.shape_cast %83 : vector<32xf32> to vector<32x1xf32>
    %c0_61 = arith.constant 0 : index
    %c0_62 = arith.constant 0 : index
    %85 = vector.load %arg23[%c0_61, %c0_62] : memref<16x256xf32, #tpu.memory_space<vmem>>, vector<16x256xf32>
    %cst_63 = arith.constant dense<0.000000e+00> : vector<4x256xf32>
    %86 = tpu.matmul %68, %85, %cst_63 {dimension_numbers = #tpu.dot_dimension_numbers<[1], [0], [0], [1], [0, 0, 1, 1], [], []>, precision = #tpu.contract_precision<fp32>} : vector<4x16xf32>, vector<16x256xf32>, vector<4x256xf32> -> vector<4x256xf32>
    %c0_64 = arith.constant 0 : index
    %c0_65 = arith.constant 0 : index
    %87 = vector.load %arg24[%c0_64, %c0_65] : memref<16x256xf32, #tpu.memory_space<vmem>>, vector<16x256xf32>
    %cst_66 = arith.constant dense<0.000000e+00> : vector<4x256xf32>
    %88 = tpu.matmul %78, %87, %cst_66 {dimension_numbers = #tpu.dot_dimension_numbers<[1], [0], [0], [1], [0, 0, 1, 1], [], []>, precision = #tpu.contract_precision<fp32>} : vector<4x16xf32>, vector<16x256xf32>, vector<4x256xf32> -> vector<4x256xf32>
    %89 = arith.mulf %86, %88 : vector<4x256xf32>
    %c0_67 = arith.constant 0 : index
    %c0_68 = arith.constant 0 : index
    %90 = vector.load %arg21[%c0_67, %c0_68] : memref<32x4xf32, #tpu.memory_space<vmem>>, vector<32x4xf32>
    %cst_69 = arith.constant dense<0.000000e+00> : vector<32x256xf32>
    %91 = tpu.matmul %90, %89, %cst_69 {dimension_numbers = #tpu.dot_dimension_numbers<[1], [0], [0], [1], [0, 0, 1, 1], [], []>, precision = #tpu.contract_precision<fp32>} : vector<32x4xf32>, vector<4x256xf32>, vector<32x256xf32> -> vector<32x256xf32>
    %92 = arith.extf %1 : vector<32x256xbf16> to vector<32x256xf32>
    %93 = vector.broadcast %84 : vector<32x1xf32> to vector<32x256xf32>
    %94 = arith.mulf %92, %93 : vector<32x256xf32>
    %95 = arith.mulf %94, %91 : vector<32x256xf32>
    %c0_70 = arith.constant 0 : index
    %c0_71 = arith.constant 0 : index
    %c0_72 = arith.constant 0 : index
    %96 = vector.load %arg25[%c0_70, %c0_71, %c0_72] : memref<1x32x256xf32, #tpu.memory_space<vmem>>, vector<1x32x256xf32>
    %97 = vector.shape_cast %96 : vector<1x32x256xf32> to vector<32x256xf32>
    %98 = vector.shape_cast %95 : vector<32x256xf32> to vector<1x32x256xf32>
    tpu.vector_store %arg25[%c0_70, %c0_71, %c0_72], %98 {strides = array<i32>} : memref<1x32x256xf32, #tpu.memory_space<vmem>>, vector<1x32x256xf32>,
    return
  }
  func.func @transform_0(%arg0: i32) -> (i32, i32, i32) {
    %c0_i32 = arith.constant 0 : i32
    %c0_i32_0 = arith.constant 0 : i32
    %c0_i32_1 = arith.constant 0 : i32
    return %arg0, %c0_i32, %c0_i32_0 : i32, i32, i32
  }
  func.func @transform_1(%arg0: i32) -> (i32, i32) {
    %c0_i32 = arith.constant 0 : i32
    %c0_i32_0 = arith.constant 0 : i32
    %c0_i32_1 = arith.constant 0 : i32
    return %c0_i32, %c0_i32_0 : i32, i32
  }
  func.func @transform_2(%arg0: i32) -> (i32, i32) {
    %c0_i32 = arith.constant 0 : i32
    %c0_i32_0 = arith.constant 0 : i32
    %c0_i32_1 = arith.constant 0 : i32
    return %c0_i32, %c0_i32_0 : i32, i32
  }
  func.func @transform_3(%arg0: i32) -> (i32, i32) {
    %c0_i32 = arith.constant 0 : i32
    %c0_i32_0 = arith.constant 0 : i32
    %c0_i32_1 = arith.constant 0 : i32
    return %c0_i32, %c0_i32_0 : i32, i32
  }
  func.func @transform_4(%arg0: i32) -> (i32, i32) {
    %c0_i32 = arith.constant 0 : i32
    %c0_i32_0 = arith.constant 0 : i32
    %c0_i32_1 = arith.constant 0 : i32
    return %c0_i32, %c0_i32_0 : i32, i32
  }
  func.func @transform_5(%arg0: i32) -> (i32, i32) {
    %c0_i32 = arith.constant 0 : i32
    %c0_i32_0 = arith.constant 0 : i32
    %c0_i32_1 = arith.constant 0 : i32
    return %c0_i32, %c0_i32_0 : i32, i32
  }
  func.func @transform_6(%arg0: i32) -> (i32, i32) {
    %c0_i32 = arith.constant 0 : i32
    %c0_i32_0 = arith.constant 0 : i32
    %c0_i32_1 = arith.constant 0 : i32
    return %c0_i32, %c0_i32_0 : i32, i32
  }
  func.func @transform_7(%arg0: i32) -> (i32, i32) {
    %c0_i32 = arith.constant 0 : i32
    %c0_i32_0 = arith.constant 0 : i32
    %c0_i32_1 = arith.constant 0 : i32
    return %c0_i32, %c0_i32_0 : i32, i32
  }
  func.func @transform_8(%arg0: i32) -> (i32, i32) {
    %c0_i32 = arith.constant 0 : i32
    %c0_i32_0 = arith.constant 0 : i32
    %c0_i32_1 = arith.constant 0 : i32
    return %c0_i32, %c0_i32_0 : i32, i32
  }
  func.func @transform_9(%arg0: i32) -> (i32, i32) {
    %c0_i32 = arith.constant 0 : i32
    %c0_i32_0 = arith.constant 0 : i32
    %c0_i32_1 = arith.constant 0 : i32
    return %c0_i32, %c0_i32_0 : i32, i32
  }
  func.func @transform_10(%arg0: i32) -> (i32, i32) {
    %c0_i32 = arith.constant 0 : i32
    %c0_i32_0 = arith.constant 0 : i32
    %c0_i32_1 = arith.constant 0 : i32
    return %c0_i32, %c0_i32_0 : i32, i32
  }
  func.func @transform_11(%arg0: i32) -> (i32, i32) {
    %c0_i32 = arith.constant 0 : i32
    %c0_i32_0 = arith.constant 0 : i32
    %c0_i32_1 = arith.constant 0 : i32
    return %c0_i32, %c0_i32_0 : i32, i32
  }
  func.func @transform_12(%arg0: i32) -> (i32, i32) {
    %c0_i32 = arith.constant 0 : i32
    %c0_i32_0 = arith.constant 0 : i32
    %c0_i32_1 = arith.constant 0 : i32
    return %c0_i32, %c0_i32_0 : i32, i32
  }
  func.func @transform_13(%arg0: i32) -> (i32, i32) {
    %c0_i32 = arith.constant 0 : i32
    %c0_i32_0 = arith.constant 0 : i32
    %c0_i32_1 = arith.constant 0 : i32
    return %c0_i32, %c0_i32_0 : i32, i32
  }
  func.func @transform_14(%arg0: i32) -> (i32, i32) {
    %c0_i32 = arith.constant 0 : i32
    %c0_i32_0 = arith.constant 0 : i32
    %c0_i32_1 = arith.constant 0 : i32
    return %c0_i32, %c0_i32_0 : i32, i32
  }
  func.func @transform_15(%arg0: i32) -> (i32, i32) {
    %c0_i32 = arith.constant 0 : i32
    %c0_i32_0 = arith.constant 0 : i32
    %c0_i32_1 = arith.constant 0 : i32
    return %c0_i32, %c0_i32_0 : i32, i32
  }
  func.func @transform_16(%arg0: i32) -> (i32, i32) {
    %c0_i32 = arith.constant 0 : i32
    %c0_i32_0 = arith.constant 0 : i32
    %c0_i32_1 = arith.constant 0 : i32
    return %c0_i32, %c0_i32_0 : i32, i32
  }
  func.func @transform_17(%arg0: i32) -> (i32, i32) {
    %c0_i32 = arith.constant 0 : i32
    %c0_i32_0 = arith.constant 0 : i32
    %c0_i32_1 = arith.constant 0 : i32
    return %c0_i32, %c0_i32_0 : i32, i32
  }
  func.func @transform_18(%arg0: i32) -> (i32, i32) {
    %c0_i32 = arith.constant 0 : i32
    %c0_i32_0 = arith.constant 0 : i32
    %c0_i32_1 = arith.constant 0 : i32
    return %c0_i32, %c0_i32_0 : i32, i32
  }
  func.func @transform_19(%arg0: i32) -> (i32, i32) {
    %c0_i32 = arith.constant 0 : i32
    %c0_i32_0 = arith.constant 0 : i32
    %c0_i32_1 = arith.constant 0 : i32
    return %c0_i32, %c0_i32_0 : i32, i32
  }
  func.func @transform_20(%arg0: i32) -> (i32, i32) {
    %c0_i32 = arith.constant 0 : i32
    %c0_i32_0 = arith.constant 0 : i32
    %c0_i32_1 = arith.constant 0 : i32
    return %c0_i32, %c0_i32_0 : i32, i32
  }
  func.func @transform_21(%arg0: i32) -> (i32, i32) {
    %c0_i32 = arith.constant 0 : i32
    %c0_i32_0 = arith.constant 0 : i32
    %c0_i32_1 = arith.constant 0 : i32
    return %c0_i32, %c0_i32_0 : i32, i32
  }
  func.func @transform_22(%arg0: i32) -> (i32, i32) {
    %c0_i32 = arith.constant 0 : i32
    %c0_i32_0 = arith.constant 0 : i32
    %c0_i32_1 = arith.constant 0 : i32
    return %c0_i32, %c0_i32_0 : i32, i32
  }
  func.func @transform_23(%arg0: i32) -> (i32, i32) {
    %c0_i32 = arith.constant 0 : i32
    %c0_i32_0 = arith.constant 0 : i32
    %c0_i32_1 = arith.constant 0 : i32
    return %c0_i32, %c0_i32_0 : i32, i32
  }
  func.func @transform_24(%arg0: i32) -> (i32, i32, i32) {
    %c0_i32 = arith.constant 0 : i32
    %c0_i32_0 = arith.constant 0 : i32
    %c0_i32_1 = arith.constant 0 : i32
    return %arg0, %c0_i32, %c0_i32_0 : i32, i32, i32
  }
}

</mosaic_0001>

<bundles_post_ra>
// kernel: attention3d_up_forward.1
= control target key start
LH: loop header
LB: loop body
LE: loop exit
PB: predicated region body
PF: predicated region fallthrough
CT: control target
= control target key end

     0   :  { %s7833_s27 = smov 0   ;;  %s8504_s0 = inlined_call_operand.vmem [shape: bf16[2,32,256], index: 0, kind: input, shape index: {}]   ;;  %s8505_s1 = inlined_call_operand.vmem [shape: bf16[256,17], index: 1, kind: input, shape index: {}]   ;;  %s8506_s2 = inlined_call_operand.vmem [shape: f32[4,32], index: 2, kind: input, shape index: {}]   ;;  %s8507_s3 = inlined_call_operand.vmem [shape: f32[32,16], index: 3, kind: input, shape index: {}]   ;;  %s8508_s4 = inlined_call_operand.vmem [shape: f32[4,32], index: 4, kind: input, shape index: {}]   ;;  %s8509_s5 = inlined_call_operand.vmem [shape: f32[12,4], index: 5, kind: input, shape index: {}]   ;;  %s8510_s6 = inlined_call_operand.vmem [shape: f32[12,4], index: 6, kind: input, shape index: {}]   ;;  %s8511_s7 = inlined_call_operand.vmem [shape: f32[16,16], index: 7, kind: input, shape index: {}]   ;;  %s8512_s8 = inlined_call_operand.vmem [shape: f32[16,16], index: 8, kind: input, shape index: {}]   ;;  %s8513_s9 = inlined_call_operand.vmem [shape: f32[12,3], index: 9, kind: input, shape index: {}]   ;;  %s8514_s10 = inlined_call_operand.vmem [shape: f32[12,1], index: 10, kind: input, shape index: {}]   ;;  %s8515_s11 = inlined_call_operand.vmem [shape: f32[12,1], index: 11, kind: input, shape index: {}]   ;;  %s8516_s12 = inlined_call_operand.vmem [shape: f32[1,12], index: 12, kind: input, shape index: {}]   ;;  %s8517_s13 = inlined_call_operand.<no memory space> [shape: f32[1,1], index: 13, kind: input, shape index: {}]   ;;  %s8518_s14 = inlined_call_operand.vmem [shape: f32[4,1], index: 14, kind: input, shape index: {}]   ;;  %s8519_s15 = inlined_call_operand.vmem [shape: f32[4,1], index: 15, kind: input, shape index: {}]   ;;  %s8520_s16 = inlined_call_operand.vmem [shape: f32[4,1], index: 16, kind: input, shape index: {}]   ;;  %s8521_s17 = inlined_call_operand.vmem [shape: f32[4,1], index: 17, kind: input, shape index: {}]   ;;  %s8522_s18 = inlined_call_operand.vmem [shape: f32[4,1], index: 18, kind: input, shape index: {}]   ;;  %s8523_s19 = inlined_call_operand.vmem [shape: f32[4,1], index: 19, kind: input, shape index: {}]   ;;  %s8524_s20 = inlined_call_operand.vmem [shape: f32[32,4], index: 20, kind: input, shape index: {}]   ;;  %s8525_s21 = inlined_call_operand.vmem [shape: f32[32,16], index: 21, kind: input, shape index: {}]   ;;  %s8526_s22 = inlined_call_operand.vmem [shape: f32[16,256], index: 22, kind: input, shape index: {}]   ;;  %s8527_s23 = inlined_call_operand.vmem [shape: f32[16,256], index: 23, kind: input, shape index: {}]   ;;  %s8528_s24 = inlined_call_operand.vmem [shape: f32[2,32,256], index: 24, kind: output, shape index: {}]  }
   0x1   :  { %8536 = sst [smem:[#allocation3_spill]] %s8504_s0  ;;  %v29_v0 = vstv %s8517_s13 }
   0x2   :  { %8537 = sst [smem:[#allocation4_spill]] %s8505_s1  ;;  %30 = vst [vmem:[#allocation2] sm:$0x1] %v29_v0 }
   0x3   :  { %8538 = sst [smem:[#allocation5_spill]] %s8506_s2 }
   0x4   :  { %8539 = sst [smem:[#allocation6_spill]] %s8507_s3 }
   0x5   :  { %8540 = sst [smem:[#allocation7_spill]] %s8508_s4 }
   0x6   :  { %8541 = sst [smem:[#allocation8_spill]] %s8509_s5 }
   0x7   :  { %8542 = sst [smem:[#allocation9_spill]] %s8510_s6 }
   0x8   :  { %8543 = sst [smem:[#allocation10_spill]] %s8511_s7 }
   0x9   :  { %8544 = sst [smem:[#allocation11_spill]] %s8512_s8 }
   0xa LB: > { %s6715_s28 = sadd.s32 4294967295, %s7695_s27   ;;  %p6719_p0 = scmp.ge.s32.totalorder %s7695_s27, 1  ;;  %s7695_s27 = sphi %s7833_s27, %s36_s27  }
   0xb   : > { %p664_p1 = scmp.lt.s32.totalorder %s7695_s27, 3 }
   0xd   : > { %p665_p2 = pnand %p6719_p0, %p664_p1 }
   0xe   : > { %s8545_s29 = sld [smem:[#allocation4_spill]] (!%p665_p2)  ;;  %p730_p3 = scmp.lt.s32.totalorder (!%p665_p2), %s6715_s28, 1  ;;  %v7697_v25 = vmov (!%p665_p2), 0   ;;  %v7699_v38 = vmov (!%p665_p2), 0.0|0.0   ;;  %v7908_v39 = vld [vmem:[%s8513_s9] sm:$0xff] (!%p665_p2)  ;;  %vm7700_vm0 = vmmov (!%p665_p2), 0  }
   0xf   : > { %668 = sbr.rel (%p665_p2) target bundleno = 2351 (0x92f), region = 116  ;;  %s8546_s8 = sld [smem:[#allocation3_spill]] (!%p665_p2)  ;;  %7645 = vset.pattern.permute.xlu0 (!%p665_p2), %v7697_v25  ;;  %7646 = vset.pattern.permute.xlu1 (!%p665_p2), %v7697_v25  ;;  %v7914_v40 = vld [vmem:[%s8513_s9 + $0x8] sm:$0xf] (!%p665_p2)  ;;  %v7701_v41 = vmov (!%p665_p2), 0.0   ;;  %vm971_vm1 = vcmask (!%p665_p2), 261120  }
  0x10   : > { %s7698_s26 = smov (!%p665_p2), 127   ;;  %7358 = vmatprep.subr.bf16.mxu0 (!%p665_p2), %v7699_v38  ;;  %7055 = vmatprep.mubr.msk.f32.mxu0 (!%p665_p2), %vm7700_vm0, %v7701_v41  ;;  %s8547_s3 = sld [smem:[#allocation5_spill]] (!%p665_p2)  ;;  %vm1965_vm2 = vcmask (!%p665_p2), 31744   ;;  %vm1972_vm3 = vcmask (!%p665_p2), 1043456   ;;  %vm2965_vm4 = vcmask (!%p665_p2), 130048   ;;  %vm7704_vm5 = vmmov (!%p665_p2), 1  }
  0x11   : > { %s8548_s1 = sld [smem:[#allocation6_spill]] (!%p665_p2)  ;;  %s8550_s5 = sld [smem:[#allocation9_spill]] (!%p665_p2)  ;;  %vm7438_vm6 = vmpackc.low (!%p665_p2), %vm1972_vm3, %vm7704_vm5  ;;  %vm4057_vm7 = vcmask (!%p665_p2), 97280   ;;  %vm4146_vm8 = vcmask (!%p665_p2), 1040384   ;;  %vm4142_vm9 = vcmask (!%p665_p2), 7168  }
  0x12   : > { %s8551_s0 = sld [smem:[#allocation8_spill]] (!%p665_p2)  ;;  %s8553_s7 = sld [smem:[#allocation11_spill]] (!%p665_p2) }
  0x14   : > { %v7653_v1 = vld [vmem:[%s8545_s29 + $0x40] sm:$0xff] (!%p665_p2)   ;;  %v7655_v3 = vld [vmem:[%s8545_s29 + $0x48] sm:$0xff] (!%p665_p2)   ;;  %v7657_v5 = vld [vmem:[%s8545_s29 + $0x50] sm:$0xff] (!%p665_p2)  }
  0x15   : > { %v7654_v2 = vld [vmem:[%s8545_s29] sm:$0xff] (!%p665_p2)   ;;  %6759 = vmatprep.subr.bf16.mxu1 (!%p665_p2), %v7653_v1  ;;  %v7656_v4 = vld [vmem:[%s8545_s29 + $0x8] sm:$0xff] (!%p665_p2)   ;;  %v7658_v6 = vld [vmem:[%s8545_s29 + $0x10] sm:$0xff] (!%p665_p2)  }
  0x16   : > { %6760 = vmatpush3.bf16.msra.mxu1 %v7654_v2  ;;  %s8555_s28 = smov (!%p730_p3, %s6715_s28), 1  ;;  %v7659_v7 = vld [vmem:[%s8545_s29 + $0x58] sm:$0xff]   ;;  %v7661_v9 = vld [vmem:[%s8545_s29 + $0x60] sm:$0xff]   ;;  %v7663_v11 = vld [vmem:[%s8545_s29 + $0x68] sm:$0xff]  }
  0x17   : > { %6761 = vmatprep.subr.bf16.mxu1 %v7655_v3  ;;  %s6757_s2 = sshll.u32 %s8555_s28, 5  ;;  %v7660_v8 = vld [vmem:[%s8545_s29 + $0x18] sm:$0xff]   ;;  %v7662_v10 = vld [vmem:[%s8545_s29 + $0x20] sm:$0xff]   ;;  %v7664_v15 = vld [vmem:[%s8545_s29 + $0x28] sm:$0xff]   ;;  %s6758_s13 = sshll.u32 %s8555_s28, 6 }
  0x18   : > { %s7874_s4 = scalar_lea.vmem %s8546_s8, %s6757_s2  ;;  %v7665_v16 = vld [vmem:[%s8545_s29 + $0x70] sm:$0xff]   ;;  %v7667_v18 = vld [vmem:[%s8545_s29 + $0x78] sm:$0xff]   ;;  %v942_v42 = vld [vmem:[%s8547_s3] sm:$0xf]  ;;  %s8549_s3 = sld [smem:[#allocation7_spill]] }
  0x19   : > { %v741_v12 = vld [vmem:[%s7874_s4] sm:$0xff]  ;;  %v742_v13 = vld [vmem:[%s7874_s4 + $0x8] sm:$0xff]  ;;  %v7666_v17 = vld [vmem:[%s8545_s29 + $0x30] sm:$0xff]   ;;  %v973_v44 = vsel %vm971_vm1, %v942_v42, 0  ;;  %s8552_s8 = sld [smem:[#allocation10_spill]] }
  0x1a   : > { %6762 = vmatpush3.bf16.msra.mxu1 %v7656_v4  ;;  %v6725_v14 = vcombine.high %v741_v12, %v742_v13  ;;  %v7668_v19 = vld [vmem:[%s8545_s29 + $0x38] sm:$0xff]   ;;  %v743_v20 = vld [vmem:[%s7874_s4 + $0x10] sm:$0xff]  ;;  %v6724_v22 = vcombine.low %v741_v12, %v742_v13  ;;  %v943_v43 = vld [vmem:[%s8548_s1] sm:$0xff]  ;;  %v7931_v48 = vand.u32 4294901760, %v973_v44 }
  0x1b   : > { %6763 = vmatprep.subr.bf16.mxu1 %v7657_v5  ;;  %v744_v21 = vld [vmem:[%s7874_s4 + $0x18] sm:$0xff]  ;;  %v944_v47 = vld [vmem:[%s8548_s1 + $0x8] sm:$0xff]  ;;  %v945_v52 = vld [vmem:[%s8548_s1 + $0x10] sm:$0xff] }
  0x1c   : > { %925 = vmatprep.mubr.bf16.mxu1 %v6725_v14  ;;  %v6727_v23 = vcombine.high %v743_v20, %v744_v21  ;;  %v6726_v24 = vcombine.low %v743_v20, %v744_v21  ;;  %v7937_v53 = vsub.f32 %v973_v44, %v7931_v48  ;;  %v946_v62 = vld [vmem:[%s8548_s1 + $0x18] sm:$0xff] }
  0x1e   : > { %6764 = vmatpush3.bf16.msra.mxu1 %v7658_v6  ;;  %v1046_v63 = vand.u32 4294901760, %v7937_v53 }
  0x1f   : > { %6765 = vmatprep.subr.bf16.mxu1 %v7659_v7 }
  0x22   : > { %6766 = vmatpush3.bf16.msra.mxu1 %v7660_v8 }
  0x23   : > { %6767 = vmatprep.subr.bf16.mxu1 %v7661_v9 }
  0x26   : > { %6768 = vmatpush3.bf16.msra.mxu1 %v7662_v10  ;;  %v1047_v10 = vsub.f32 %v7937_v53, %v1046_v63 }
  0x27   : > { %6769 = vmatprep.subr.bf16.mxu1 %v7663_v11 }
  0x28   : > { %v1048_v20 = vand.u32 4294901760, %v1047_v10 }
  0x2a   : > { %6770 = vmatpush3.bf16.msra.mxu1 %v7664_v15 }
  0x2b   : > { %6771 = vmatprep.subr.bf16.mxu1 %v7665_v16 }
  0x2e   : > { %6772 = vmatpush3.bf16.msra.mxu1 %v7666_v17 }
  0x2f   : > { %6773 = vmatprep.subr.bf16.mxu1 %v7667_v18 }
  0x32   : > { %6774 = vmatpush3.bf16.msra.mxu1 %v7668_v19 }
  0x33   : > { %7316 = vmatprep.subr.bf16.mxu1 %v7699_v38 }
  0x35   : > { %926 = vmatmul.mubr.bf16.vlgmr.msra.gmra.mrb[0].mxu1 %v6724_v22 }
  0x36   : > { %933 = vmatprep.mubr.bf16.mxu1 %v6727_v23 }
  0x3d   : > { %934 = vmatmul.mubr.bf16.gmra.mrb[4].mxu1 %v6726_v24 }
  0x3e   : > { %6978 = vmatprep.mubr.msk.f32.mxu1 %vm7700_vm0, %v7701_v41 }
 0x108   : > { %v6775_v26 = vpop.f32.mrb[0].mxu1 }
 0x109   : > { %v6776_v27 = vpop.f32.mrb[1].mxu1 }
 0x10a   : > { %v6777_v28 = vadd.f32 %v6776_v27, %v6775_v26  ;;  %v6778_v29 = vpop.f32.mrb[2].mxu1 }
 0x10b   : > { %v6779_v30 = vpop.f32.mrb[3].mxu1 }
 0x10c   : > { %v6780_v31 = vadd.f32 %v6779_v30, %v6778_v29  ;;  %949 = vperm.xlu0 %7645, %v6777_v28  }
 0x110   : > { %v6781_v32 = vpop.f32.mrb[4].mxu1  ;;  %954 = vperm.xlu0 %7645, %v6780_v31  }
 0x111   : > { %v6782_v33 = vpop.f32.mrb[5].mxu1 }
 0x112   : > { %v6783_v34 = vadd.f32 %v6782_v33, %v6781_v32  ;;  %v6784_v35 = vpop.f32.mrb[6].mxu1 }
 0x113   : > { %v6785_v36 = vpop.f32.mrb[7].mxu1 }
 0x114   : > { %v6786_v37 = vadd.f32 %v6785_v36, %v6784_v35  ;;  %959 = vperm.xlu1 %7646, %v6783_v34   ;;  %1461 = vrot.lane.b32.xlu0 %v6777_v28, %s7698_s26 }
 0x118   : > { %964 = vperm.xlu1 %7646, %v6786_v37   ;;  %1465 = vrot.lane.b32.xlu0 %v6783_v34, %s7698_s26 }
 0x11c   : > { %1463 = vrot.lane.b32.xlu1 %v6780_v31, %s7698_s26  ;;  %3982 = vperm.xlu0 %7645, %v7908_v39  }
 0x120   : > { %1467 = vrot.lane.b32.xlu1 %v6786_v37, %s7698_s26 }
 0x124   : > { %3987 = vperm.xlu1 %7646, %v7914_v40  }
 0x18b   : > { %v950_v45 = vpop.permute.xlu0 %949 }
 0x18c   : > { %v967_v46 = vmul.f32 %v950_v45, %v943_v43 }
 0x18e   : > { %v976_v49 = vand.u32 4294901760, %v967_v46 }
 0x18f   : > { %v955_v50 = vpop.permute.xlu0 %954 }
 0x190   : > { %v968_v51 = vmul.f32 %v955_v50, %v944_v47  ;;  %v7939_v54 = vsub.f32 %v967_v46, %v976_v49 }
 0x192   : > { %v979_v55 = vand.u32 4294901760, %v968_v51  ;;  %v1057_v0 = vand.u32 4294901760, %v7939_v54 }
 0x193   : > { %v960_v56 = vpop.permute.xlu1 %959  ;;  %v7941_v57 = vpop.permute.xlu0 %1461 }
 0x194   : > { %v7943_v58 = vpack.c.bf16 %v979_v55, %v976_v49  ;;  %v7945_v59 = vsub.f32 %v968_v51, %v979_v55  ;;  %v969_v60 = vmul.f32 %v960_v56, %v945_v52  ;;  %v1477_v61 = vand.u32 4294901760, %v7941_v57  ;;  %v1460_v49 = vld [vmem:[%s8549_s3] sm:$0xf]  ;;  %s8489_s3 = scalar_lea.vmem %s8528_s24, %s6758_s13 }
 0x195   : > { %v1058_v11 = vsub.f32 %v7939_v54, %v1057_v0  ;;  %v1474_v56 = vsel %vm971_vm1, %v1460_v49, 0 }
 0x196   : > { %v1064_v1 = vand.u32 4294901760, %v7945_v59  ;;  %v982_v2 = vand.u32 4294901760, %v969_v60  ;;  %7318 = vmatpush3.bf16.msra.mxu1 %v7943_v58  ;;  %v7967_v9 = vsub.f32 %v7941_v57, %v1477_v61  ;;  %v7329_v51 = vpack.c.bf16 %v7945_v59, %v7939_v54 }
 0x197   : > { %v965_v3 = vpop.permute.xlu1 %964  ;;  %v7955_v4 = vpop.permute.xlu0 %1465  ;;  %7319 = vmatprep.subr.bf16.mxu1 %v7699_v38  ;;  %v1059_v22 = vand.u32 4294901760, %v1058_v11 }
 0x198   : > { %v1065_v5 = vsub.f32 %v7945_v59, %v1064_v1  ;;  %v7961_v6 = vsub.f32 %v969_v60, %v982_v2  ;;  %v970_v7 = vmul.f32 %v965_v3, %v946_v62  ;;  %v1483_v8 = vand.u32 4294901760, %v7955_v4 }
 0x199   : > { %v1558_v21 = vand.u32 4294901760, %v7967_v9  ;;  %v7341_v11 = vpack.c.bf16 %v1064_v1, %v1057_v0 }
 0x19a   : > { %v1071_v12 = vand.u32 4294901760, %v7961_v6  ;;  %v985_v13 = vand.u32 4294901760, %v970_v7  ;;  %v1066_v15 = vand.u32 4294901760, %v1065_v5  ;;  %v7985_v18 = vsub.f32 %v7955_v4, %v1483_v8 }
 0x19b   : > { %v7976_v14 = vpop.permute.xlu1 %1463  ;;  %v1559_v32 = vsub.f32 %v7967_v9, %v1558_v21 }
 0x19c   : > { %v7978_v16 = vpack.c.bf16 %v985_v13, %v982_v2  ;;  %v7980_v17 = vsub.f32 %v970_v7, %v985_v13  ;;  %v1480_v19 = vand.u32 4294901760, %v7976_v14  ;;  %v1072_v23 = vsub.f32 %v7961_v6, %v1071_v12  ;;  %v1964_v13 = vld [vmem:[%s8550_s5 + $0x8] sm:$0xf] }
 0x19d   : > { %v1572_v29 = vand.u32 4294901760, %v7985_v18  ;;  %v7323_v31 = vpack.c.bf16 %v1066_v15, %v1059_v22  ;;  %v1560_v45 = vand.u32 4294901760, %v1559_v32  ;;  %v1545_v2 = vand.u32 4294901760, %v1474_v56 }
 0x19e   : > { %v1078_v24 = vand.u32 4294901760, %v7980_v17  ;;  %7321 = vmatpush3.bf16.msra.mxu1 %v7978_v16  ;;  %v7997_v26 = vsub.f32 %v7976_v14, %v1480_v19  ;;  %v1073_v34 = vand.u32 4294901760, %v1072_v23  ;;  %v7332_v62 = vpack.c.bf16 %v7980_v17, %v7961_v6 }
 0x19f   : > { %v7999_v27 = vpop.permute.xlu1 %1467  ;;  %7322 = vmatprep.subr.bf16.mxu1 %v7699_v38  ;;  %v1573_v42 = vsub.f32 %v7985_v18, %v1572_v29  ;;  %v1546_v7 = vsub.f32 %v1474_v56, %v1545_v2  ;;  %v7353_v10 = vpack.c.bf16 %v1480_v19, %v1477_v61  ;;  %v1970_v14 = vsel %vm1965_vm2, %v1964_v13, 0 }
 0x1a0   : > { %v1079_v28 = vsub.f32 %v7980_v17, %v1078_v24  ;;  %v1486_v30 = vand.u32 4294901760, %v7999_v27  ;;  %v1565_v33 = vand.u32 4294901760, %v7997_v26  ;;  %v7365_v3 = vpack.c.bf16 %v7997_v26, %v7967_v9 }
 0x1a1   : > { %6979 = vmatmul.mubr.f32.vlgmr.msra.gmra.mrb[8].mxu1 %v1048_v20  ;;  %v1574_v52 = vand.u32 4294901760, %v1573_v42  ;;  %v7344_v54 = vpack.c.bf16 %v1078_v24, %v1071_v12  ;;  %v1547_v59 = vand.u32 4294901760, %v1546_v7  ;;  %v7702_v12 = vmov 1   ;;  %v1962_v42 = vld [vmem:[%s8551_s0 + $0x8] sm:$0xf] }
 0x1a2   : > { %v1080_v35 = vand.u32 4294901760, %v1079_v28  ;;  %v8012_v36 = vsub.f32 %v7999_v27, %v1486_v30  ;;  %7324 = vmatpush3.bf16.msra.mxu1 %v7323_v31  ;;  %6989 = vmatprep.mubr.msk.f32.mxu1 %vm7700_vm0, %v7701_v41  ;;  %v1566_v37 = vsub.f32 %v7997_v26, %v1565_v33  ;;  %v7356_v57 = vpack.c.bf16 %v1486_v30, %v1483_v8 }
 0x1a3   : > { %7325 = vmatprep.subr.bf16.mxu1 %v7699_v38  ;;  %7648 = vset.pattern.permute.xlu1 %v7702_v12  ;;  %v2052_v15 = vand.u32 4294901760, %v1970_v14 }
 0x1a4   : > { %v1579_v43 = vand.u32 4294901760, %v8012_v36  ;;  %v7326_v44 = vpack.c.bf16 %v1080_v35, %v1073_v34  ;;  %v1567_v46 = vand.u32 4294901760, %v1566_v37  ;;  %v7368_v5 = vpack.c.bf16 %v8012_v36, %v7985_v18  ;;  %7647 = vset.pattern.permute.xlu0 %v7702_v12  ;;  %3997 = vperm.xlu1 %7648, %v7914_v40   ;;  %v1961_v34 = vld [vmem:[%s8551_s0] sm:$0xff] }
 0x1a5   : > { %3993 = vperm.xlu0 %7647, %v7908_v39   ;;  %v2053_v17 = vsub.f32 %v1970_v14, %v2052_v15  ;;  %v2466_v35 = vsel %vm1965_vm2, %v1961_v34, 0 }
 0x1a6   : > { %v1580_v47 = vsub.f32 %v8012_v36, %v1579_v43  ;;  %7327 = vmatpush3.bf16.msra.mxu1 %v7326_v44  ;;  %v7359_v50 = vpack.c.bf16 %v1567_v46, %v1560_v45  ;;  %v7380_v61 = vpack.c.bf16 %v1579_v43, %v1572_v29  ;;  %v2540_v37 = vand.u32 4294901760, %v2466_v35 }
 0x1a7   : > { %7328 = vmatprep.subr.bf16.mxu1 %v7699_v38  ;;  %v2054_v19 = vand.u32 4294901760, %v2053_v17  ;;  %v2469_v45 = vsel %vm1965_vm2, %v1962_v42, 0 }
 0x1a8   : > { %v1581_v55 = vand.u32 4294901760, %v1580_v47  ;;  %7360 = vmatpush3.bf16.msra.mxu0 %v7359_v50  ;;  %v2541_v44 = vsub.f32 %v2466_v35, %v2540_v37  ;;  %v2550_v47 = vand.u32 4294901760, %v2469_v45 }
 0x1a9   : > { %6990 = vmatmul.mubr.f32.vlgmr.msra.gmra.mrb[8].mxu1 %v7931_v48  ;;  %7361 = vmatprep.subr.bf16.mxu0 %v7699_v38  ;;  %v2055_v23 = vsub.f32 %v2053_v17, %v2054_v19 }
 0x1aa   : > { %7330 = vmatpush3.bf16.msra.mxu1 %v7329_v51  ;;  %v7362_v60 = vpack.c.bf16 %v1581_v55, %v1574_v52  ;;  %7000 = vmatprep.mubr.msk.f32.mxu1 %vm7700_vm0, %v7701_v41  ;;  %v2542_v49 = vand.u32 4294901760, %v2541_v44  ;;  %v2551_v51 = vsub.f32 %v2469_v45, %v2550_v47 }
 0x1ab   : > { %7331 = vmatprep.subr.bf16.mxu1 %v7699_v38  ;;  %v2056_v29 = vand.u32 4294901760, %v2055_v23 }
 0x1ac   : > { %7363 = vmatpush3.bf16.msra.mxu0 %v7362_v60  ;;  %v2543_v52 = vsub.f32 %v2541_v44, %v2542_v49  ;;  %v2552_v56 = vand.u32 4294901760, %v2551_v51 }
 0x1ad   : > { %7364 = vmatprep.subr.bf16.mxu0 %v7699_v38 }
 0x1ae   : > { %7333 = vmatpush3.bf16.msra.mxu1 %v7332_v62  ;;  %v2544_v60 = vand.u32 4294901760, %v2543_v52  ;;  %v3988_v52 = vpop.permute.xlu1 %3987 }
 0x1af   : > { %7334 = vmatprep.subr.bf16.mxu1 %v7699_v38  ;;  %7056 = vmatmul.mubr.f32.vlgmr.msra.gmra.mrb[0].mxu0 %v1545_v2 }
 0x1b0   : > { %7366 = vmatpush3.bf16.msra.mxu0 %v7365_v3  ;;  %7066 = vmatprep.mubr.msk.f32.mxu0 %vm7700_vm0, %v7701_v41 }
 0x1b1   : > { %7001 = vmatmul.mubr.f32.vlgmr.msra.gmra.mrb[8].mxu1 %v7937_v53  ;;  %7367 = vmatprep.subr.bf16.mxu0 %v7699_v38  ;;  %v7377_v53 = vpack.c.bf16 %v1565_v33, %v1558_v21 }
 0x1b2   : > { %7336 = vmatpush3.bf16.msra.mxu1 %v7943_v58  ;;  %7011 = vmatprep.mubr.msk.f32.mxu1 %vm7700_vm0, %v7701_v41 }
 0x1b3   : > { %7337 = vmatprep.subr.bf16.mxu1 %v7699_v38 }
 0x1b4   : > { %7369 = vmatpush3.bf16.msra.mxu0 %v7368_v5  ;;  %v2963_v5 = vld [vmem:[%s8552_s8] sm:$0xff] }
 0x1b5   : > { %7370 = vmatprep.subr.bf16.mxu0 %v7699_v38 }
 0x1b6   : > { %7339 = vmatpush3.bf16.msra.mxu1 %v7978_v16 }
 0x1b7   : > { %7340 = vmatprep.subr.bf16.mxu1 %v7699_v38  ;;  %7067 = vmatmul.mubr.f32.vlgmr.msra.gmra.mrb[0].mxu0 %v1546_v7 }
 0x1b8   : > { %7372 = vmatpush3.bf16.msra.mxu0 %v7353_v10  ;;  %7077 = vmatprep.mubr.msk.f32.mxu0 %vm7700_vm0, %v7701_v41 }
 0x1b9   : > { %7012 = vmatmul.mubr.f32.vlgmr.msra.gmra.mrb[8].mxu1 %v1046_v63  ;;  %7373 = vmatprep.subr.bf16.mxu0 %v7699_v38 }
 0x1ba   : > { %7342 = vmatpush3.bf16.msra.mxu1 %v7341_v11  ;;  %7022 = vmatprep.mubr.msk.f32.mxu1 %vm7700_vm0, %v7701_v41  ;;  %v2973_v11 = vand.u32 4294901760, %v2963_v5 }
 0x1bb   : > { %7343 = vmatprep.subr.bf16.mxu1 %v7699_v38 }
 0x1bc   : > { %7375 = vmatpush3.bf16.msra.mxu0 %v7356_v57 }
 0x1bd   : > { %7376 = vmatprep.subr.bf16.mxu0 %v7699_v38 }
 0x1be   : > { %7345 = vmatpush3.bf16.msra.mxu1 %v7344_v54  ;;  %v3475_v54 = vld [vmem:[%s8553_s7 + $0x8] sm:$0xff] }
 0x1bf   : > { %7346 = vmatprep.subr.bf16.mxu1 %v7699_v38  ;;  %7078 = vmatmul.mubr.f32.vlgmr.msra.gmra.mrb[0].mxu0 %v1547_v59 }
 0x1c0   : > { %7378 = vmatpush3.bf16.msra.mxu0 %v7377_v53  ;;  %7088 = vmatprep.mubr.msk.f32.mxu0 %vm7700_vm0, %v7701_v41  ;;  %v3480_v53 = vand.u32 4294901760, %v3475_v54 }
 0x1c1   : > { %7023 = vmatmul.mubr.f32.vlgmr.msra.gmra.mrb[8].mxu1 %v7931_v48  ;;  %7379 = vmatprep.subr.bf16.mxu0 %v7699_v38 }
 0x1c2   : > { %7348 = vmatpush3.bf16.msra.mxu1 %v7943_v58  ;;  %7033 = vmatprep.mubr.msk.f32.mxu1 %vm7700_vm0, %v7701_v41  ;;  %v1548_v58 = vsub.f32 %v1546_v7, %v1547_v59  ;;  %v2964_v7 = vld [vmem:[%s8552_s8 + $0x8] sm:$0xff] }
 0x1c3   : > { %7349 = vmatprep.subr.bf16.mxu1 %v7699_v38 }
 0x1c4   : > { %7381 = vmatpush3.bf16.msra.mxu0 %v7380_v61  ;;  %v1549_v63 = vand.u32 4294901760, %v1548_v58  ;;  %v3061_v58 = vsub.f32 %v2963_v5, %v2973_v11 }
 0x1c5   : > { %7382 = vmatprep.subr.bf16.mxu0 %v7699_v38 }
 0x1c6   : > { %7351 = vmatpush3.bf16.msra.mxu1 %v7978_v16 }
 0x1c7   : > { %7352 = vmatprep.subr.bf16.mxu1 %v7699_v38  ;;  %7089 = vmatmul.mubr.f32.vlgmr.msra.gmra.mrb[0].mxu0 %v1545_v2 }
 0x1c8   : > { %7384 = vmatpush3.bf16.msra.mxu0 %v7353_v10  ;;  %7099 = vmatprep.mubr.msk.f32.mxu0 %vm7700_vm0, %v7701_v41 }
 0x1c9   : > { %7034 = vmatmul.mubr.f32.vlgmr.msra.gmra.mrb[8].mxu1 %v7931_v48  ;;  %7385 = vmatprep.subr.bf16.mxu0 %v7699_v38  ;;  %v1963_v48 = vld [vmem:[%s8550_s5] sm:$0xff] }
 0x1ca   : > { %7354 = vmatpush3.bf16.msra.mxu1 %v7353_v10  ;;  %7044 = vmatprep.mubr.msk.f32.mxu1 %vm7700_vm0, %v7701_v41  ;;  %v1967_v0 = vsel %vm1965_vm2, %v1963_v48, 0  ;;  %v3474_v10 = vld [vmem:[%s8553_s7] sm:$0xff] }
 0x1cb   : > { %7355 = vmatprep.subr.bf16.mxu1 %v7699_v38  ;;  %v8112_v1 = vand.u32 4294901760, %v1967_v0  ;;  %v3477_v59 = vand.u32 4294901760, %v3474_v10 }
 0x1cc   : > { %7387 = vmatpush3.bf16.msra.mxu0 %v7356_v57 }
 0x1cd   : > { %v2043_v4 = vsub.f32 %v1967_v0, %v8112_v1  ;;  %v3565_v48 = vsub.f32 %v3474_v10, %v3477_v59  ;;  %v8148_v0 = vpack.c.bf16 %v3480_v53, %v3477_v59 }
 0x1ce   : > { %7357 = vmatpush3.bf16.msra.mxu1 %v7356_v57  ;;  %v2976_v57 = vand.u32 4294901760, %v2964_v7 }
 0x1cf   : > { %7100 = vmatmul.mubr.f32.vlgmr.msra.gmra.mrb[0].mxu0 %v1545_v2  ;;  %v2044_v6 = vand.u32 4294901760, %v2043_v4  ;;  %v2553_v2 = vsub.f32 %v2551_v51, %v2552_v56 }
 0x1d0   : > { %v8146_v61 = vpack.c.bf16 %v2976_v57, %v2973_v11 }
 0x1d1   : > { %7045 = vmatmul.mubr.f32.vlgmr.msra.gmra.mrb[10].mxu1 %v1549_v63  ;;  %v2045_v8 = vsub.f32 %v2043_v4, %v2044_v6  ;;  %v2554_v3 = vand.u32 4294901760, %v2553_v2  ;;  %v3068_v63 = vsub.f32 %v2964_v7, %v2976_v57 }
 0x1d2   : > { %7389 = vmatprep.subr.bf16.mxu0 %v8146_v61 }
 0x1d3   : > { %v2046_v9 = vand.u32 4294901760, %v2045_v8  ;;  %v3566_v8 = vand.u32 4294901760, %v3565_v48  ;;  %7391 = vmatpush3.bf16.msra.mxu0 %v8146_v61 }
 0x1d5   : > { %7104 = vmatprep.mubr.f32.mxu1 %v2046_v9  ;;  %v3567_v14 = vsub.f32 %v3565_v48, %v3566_v8 }
 0x29c   : > { %v1456_v16 = vpop.f32.mrb[8].mxu1 }
 0x29d   : > { %v7035_v18 = vpop.f32.mrb[9].mxu1  ;;  %v2472_v36 = vsel %vm1972_vm3, %v1456_v16, 0 }
 0x29e   : > { %v2475_v43 = vand.u32 4294901760, %v2472_v36  ;;  %v3568_v18 = vand.u32 4294901760, %v3567_v14 }
 0x2a0   : > { %v2562_v46 = vsub.f32 %v2472_v36, %v2475_v43 }
 0x2a2   : > { %v1957_v20 = vpop.f32.mrb[0].mxu0  ;;  %v2563_v50 = vand.u32 4294901760, %v2562_v46 }
 0x2a3   : > { %v7101_v21 = vpop.f32.mrb[1].mxu0 }
 0x2a4   : > { %v1551_v22 = vpop.f32.mrb[10].mxu1  ;;  %v2564_v55 = vsub.f32 %v2562_v46, %v2563_v50 }
 0x2a5   : > { %v7488_v24 = vadd.f32 %v1957_v20, %v1551_v22  ;;  %v7046_v26 = vpop.f32.mrb[11].mxu1  ;;  %v7396_v22 = vpack.c.bf16 %v3068_v63, %v3061_v58 }
 0x2a6   : > { %v2565_v62 = vand.u32 4294901760, %v2564_v55  ;;  %v3998_v55 = vpop.permute.xlu1 %3997 }
 0x2a7   : > { %v1974_v27 = vsel %vm1972_vm3, %v7488_v24, 0 }
 0x2a8   : > { %v1977_v28 = vand.u32 4294901760, %v1974_v27 }
 0x2aa   : > { %v2064_v30 = vsub.f32 %v1974_v27, %v1977_v28  ;;  %7102 = vmatprep.subr.mxu1 %v1977_v28  ;;  %v7703_v27 = vmov 2  }
 0x2ab   : > { %7103 = vmatpush3.msra.mxu1 %v1977_v28  ;;  %7649 = vset.pattern.permute.xlu1 %v7703_v27 }
 0x2ac   : > { %7105 = vmatmul.mubr.f32.vlgmr.msra.gmra.mrb[12].mxu1 %v2056_v29  ;;  %v2065_v31 = vand.u32 4294901760, %v2064_v30  ;;  %7650 = vset.pattern.permute.xlu0 %v7703_v27  ;;  %v4030_v29 = vld [vmem:[%s8515_s11] sm:$0xff] }
 0x2ad   : > { %7109 = vmatprep.mubr.f32.mxu1 %v8112_v1  ;;  %4005 = vperm.xlu1 %7649, %v7908_v39   ;;  %v4017_v39 = vld [vmem:[%s8514_s10 + $0x8] sm:$0xf] }
 0x2ae   : > { %v2066_v32 = vsub.f32 %v2064_v30, %v2065_v31  ;;  %4009 = vperm.xlu0 %7650, %v7914_v40   ;;  %v4227_v40 = vld [vmem:[%s8522_s18] sm:$0xf] }
 0x2b0   : > { %v2067_v33 = vand.u32 4294901760, %v2066_v32  ;;  %v4313_v32 = vld [vmem:[%s8523_s19] sm:$0xf] }
 0x2b1   : > { %7651 = vset.pattern.permute.xlu1 %v7697_v25 }
 0x2b2   : > { %7107 = vmatprep.subr.mxu1 %v2067_v33  ;;  %7652 = vset.pattern.permute.xlu0 %v7697_v25  ;;  %v4136_v25 = vld [vmem:[%s8521_s17] sm:$0xf] }
 0x2b3   : > { %7108 = vmatpush3.msra.mxu1 %v2067_v33  ;;  %4034 = vperm.xlu0 %7652, %v4030_v29   ;;  %v4312_v29 = vld [vmem:[%s8520_s16] sm:$0xf] }
 0x2b4   : > { %7110 = vmatmul.mubr.f32.vlgmr.msra.gmra.mrb[12].mxu1 %v2052_v15  ;;  %7112 = vmatprep.subr.mxu1 %v2064_v30 }
 0x2b5   : > { %7113 = vmatpush3.msra.mxu1 %v2064_v30  ;;  %7114 = vmatprep.mubr.f32.mxu1 %v2043_v4  ;;  %v3062_v4 = vand.u32 4294901760, %v3061_v58  ;;  %v4031_v30 = vld [vmem:[%s8515_s11 + $0x8] sm:$0xf] }
 0x2b6   : > { %7117 = vmatprep.subr.mxu1 %v1977_v28 }
 0x2b7   : > { %v3063_v12 = vsub.f32 %v3061_v58, %v3062_v4  ;;  %4230 = vperm.xlu0 %7652, %v4227_v40   ;;  %v4398_v40 = vld [vmem:[%s8524_s20] sm:$0xff] }
 0x2b9   : > { %v3064_v16 = vand.u32 4294901760, %v3063_v12 }
 0x2bb   : > { %4139 = vperm.xlu0 %7652, %v4136_v25  }
 0x2bc   : > { %7115 = vmatmul.mubr.f32.vlgmr.msra.gmra.mrb[12].mxu1 %v2053_v17 }
 0x2bd   : > { %7118 = vmatpush3.msra.mxu1 %v1977_v28  ;;  %7119 = vmatprep.mubr.f32.mxu1 %v2044_v6  ;;  %v3069_v6 = vand.u32 4294901760, %v3068_v63 }
 0x2be   : > { %7122 = vmatprep.subr.mxu1 %v2065_v31 }
 0x2bf   : > { %v3070_v13 = vsub.f32 %v3068_v63, %v3069_v6  ;;  %v8154_v24 = vpack.c.bf16 %v3069_v6, %v3062_v4 }
 0x2c1   : > { %v3071_v17 = vand.u32 4294901760, %v3070_v13 }
 0x2c3   : > { %v7392_v20 = vpack.c.bf16 %v3071_v17, %v3064_v16  ;;  %v4046_v17 = vld [vmem:[%s8516_s12] sm:$0x1] }
 0x2c4   : > { %7120 = vmatmul.mubr.f32.vlgmr.msra.gmra.mrb[12].mxu1 %v2054_v19 }
 0x2c5   : > { %7123 = vmatpush3.msra.mxu1 %v2065_v31  ;;  %7124 = vmatprep.mubr.f32.mxu1 %v8112_v1  ;;  %v4047_v31 = vld [vmem:[#allocation2] sm:$0x1] }
 0x2c6   : > { %7127 = vmatprep.subr.mxu1 %v1977_v28  ;;  %7393 = vmatprep.subr.bf16.mxu0 %v7392_v20 }
 0x2cc   : > { %7125 = vmatmul.mubr.f32.vlgmr.msra.gmra.mrb[12].mxu1 %v2052_v15 }
 0x2cd   : > { %7128 = vmatpush3.msra.mxu1 %v1977_v28  ;;  %7129 = vmatprep.mubr.f32.mxu1 %v8112_v1  ;;  %v3572_v1 = vsub.f32 %v3475_v54, %v3480_v53  ;;  %v4016_v28 = vld [vmem:[%s8514_s10] sm:$0xff] }
 0x2ce   : > { %7132 = vmatprep.subr.mxu1 %v2475_v43  ;;  %4020 = vperm.xlu1 %7651, %v4016_v28   ;;  %v4135_v28 = vld [vmem:[%s8518_s14] sm:$0xf] }
 0x2cf   : > { %v3573_v9 = vand.u32 4294901760, %v3572_v1  ;;  %v7420_v23 = vpack.c.bf16 %v3572_v1, %v3565_v48 }
 0x2d1   : > { %v8156_v26 = vpack.c.bf16 %v3573_v9, %v3566_v8 }
 0x2d2   : > { %4025 = vperm.xlu1 %7651, %v4017_v39   ;;  %v4226_v39 = vld [vmem:[%s8519_s15] sm:$0xf] }
 0x2d4   : > { %7130 = vmatmul.mubr.f32.vlgmr.msra.gmra.mrb[12].mxu1 %v2052_v15  ;;  %v3574_v15 = vsub.f32 %v3572_v1, %v3573_v9 }
 0x2d5   : > { %7133 = vmatpush3.msra.mxu1 %v2475_v43  ;;  %7134 = vmatprep.mubr.f32.mxu1 %v2544_v60  ;;  %v3983_v60 = vpop.permute.xlu0 %3982 }
 0x2d6   : > { %7137 = vmatprep.subr.mxu1 %v2565_v62  ;;  %v3575_v19 = vand.u32 4294901760, %v3574_v15  ;;  %4039 = vperm.xlu1 %7651, %v4031_v30   ;;  %v4403_v30 = vsel %vm1965_vm2, %v4398_v40, 0 }
 0x2d7   : > { %v8235_v25 = vand.u32 4294901760, %v4403_v30 }
 0x2d8   : > { %v7416_v21 = vpack.c.bf16 %v3575_v19, %v3568_v18  ;;  %v4053_v18 = vlaneseq }
 0x2d9   : > { %v3994_v2 = vpop.permute.xlu0 %3993 }
 0x2da   : > { %4050 = vperm.xlu1 %7651, %v4047_v31   ;;  %v4054_v19 = vshrl.u32 %v4053_v18, 7  ;;  %v8238_v31 = vsub.f32 %v4403_v30, %v8235_v25  ;;  %v4399_v18 = vld [vmem:[%s8524_s20 + $0x8] sm:$0xff] }
 0x2dc   : > { %7135 = vmatmul.mubr.f32.vlgmr.msra.gmra.mrb[12].mxu1 %v2554_v3 }
 0x2dd   : > { %7138 = vmatpush3.msra.mxu1 %v2565_v62  ;;  %7139 = vmatprep.mubr.f32.mxu1 %v2540_v37 }
 0x2de   : > { %7142 = vmatprep.subr.mxu1 %v2562_v46  ;;  %4316 = vperm.xlu1 %7651, %v4313_v32   ;;  %v8241_v32 = vand.u32 4294901760, %v8238_v31 }
 0x2e4   : > { %7140 = vmatmul.mubr.f32.vlgmr.msra.gmra.mrb[12].mxu1 %v2550_v47 }
 0x2e5   : > { %7143 = vmatpush3.msra.mxu1 %v2562_v46  ;;  %7144 = vmatprep.mubr.f32.mxu1 %v2541_v44 }
 0x2e6   : > { %7147 = vmatprep.subr.mxu1 %v2475_v43 }
 0x2ec   : > { %7145 = vmatmul.mubr.f32.vlgmr.msra.gmra.mrb[12].mxu1 %v2551_v51 }
 0x2ed   : > { %7148 = vmatpush3.msra.mxu1 %v2475_v43  ;;  %7149 = vmatprep.mubr.f32.mxu1 %v2542_v49 }
 0x2ee   : > { %7152 = vmatprep.subr.mxu1 %v2563_v50 }
 0x2f4   : > { %7150 = vmatmul.mubr.f32.vlgmr.msra.gmra.mrb[12].mxu1 %v2552_v56 }
 0x2f5   : > { %7153 = vmatpush3.msra.mxu1 %v2563_v50  ;;  %7154 = vmatprep.mubr.f32.mxu1 %v2540_v37 }
 0x2f6   : > { %7157 = vmatprep.subr.mxu1 %v2475_v43 }
 0x2fc   : > { %7155 = vmatmul.mubr.f32.vlgmr.msra.gmra.mrb[12].mxu1 %v2550_v47 }
 0x2fd   : > { %7158 = vmatpush3.msra.mxu1 %v2475_v43  ;;  %7159 = vmatprep.mubr.f32.mxu1 %v2540_v37 }
 0x2fe   : > { %7413 = vmatprep.subr.bf16.mxu1 %v8148_v0 }
 0x304   : > { %7160 = vmatmul.mubr.f32.vlgmr.msra.gmra.mrb[12].mxu1 %v2550_v47 }
 0x305   : > { %7415 = vmatpush3.bf16.msra.mxu1 %v8148_v0 }
 0x306   : > { %7417 = vmatprep.subr.bf16.mxu1 %v7416_v21 }
 0x32c   : > { %v4006_v56 = vpop.permute.xlu1 %4005 }
 0x32d   : > { %v4010_v59 = vpop.permute.xlu0 %4009 }
 0x332   : > { %v4035_v12 = vpop.permute.xlu0 %4034 }
 0x34d   : > { %v4021_v62 = vpop.permute.xlu1 %4020 }
 0x351   : > { %v4026_v54 = vpop.permute.xlu1 %4025 }
 0x355   : > { %v4040_v6 = vpop.permute.xlu1 %4039 }
 0x3d7   : > { %v8183_v33 = vpop.f32.mrb[12].mxu1 }
 0x3d8   : > { %v2970_v34 = vsel %vm2965_vm4, %v8183_v33, 0  ;;  %v8187_v35 = vpop.f32.mrb[13].mxu1 }
 0x3d9   : > { %v3049_v36 = vand.u32 4294901760, %v2970_v34  ;;  %v2967_v37 = vsel %vm2965_vm4, %v8187_v35, 0  ;;  %v4000_v57 = vmul.f32 %v3994_v2, %v8187_v35  ;;  %v5013_v35 = vld [vmem:[%s8526_s22 + $0x8] sm:$0xff] }
 0x3da   : > { %v3039_v42 = vand.u32 4294901760, %v2967_v37 }
 0x3db   : > { %v3050_v43 = vsub.f32 %v2970_v34, %v3049_v36 }
 0x3dc   : > { %v3040_v44 = vsub.f32 %v2967_v37, %v3039_v42  ;;  %v5019_v37 = vand.u32 4294901760, %v5013_v35 }
 0x3dd   : > { %v3051_v45 = vand.u32 4294901760, %v3050_v43 }
 0x3de   : > { %v3041_v46 = vand.u32 4294901760, %v3040_v44 }
 0x3df   : > { %v3052_v47 = vsub.f32 %v3050_v43, %v3051_v45 }
 0x3e0   : > { %v3042_v49 = vsub.f32 %v3040_v44, %v3041_v46 }
 0x3e1   : > { %v3053_v51 = vand.u32 4294901760, %v3052_v47 }
 0x3e2   : > { %v3043_v50 = vand.u32 4294901760, %v3042_v49  ;;  %v8262_v49 = vsub.f32 %v5013_v35, %v5019_v37 }
 0x3e4   : > { %7166 = vmatprep.mubr.f32.mxu0 %v3043_v50  ;;  %7208 = vmatprep.mubr.f32.mxu1 %v3043_v50 }
 0x3e5   : > { %7167 = vmatmul.mubr.f32.vlgmr.msra.gmra.mrb[2].mxu0 %v3053_v51  ;;  %7209 = vmatmul.mubr.f32.vlgmr.msra.gmra.mrb[14].mxu1 %v3053_v51 }
 0x3e6   : > { %7173 = vmatprep.mubr.f32.mxu0 %v3039_v42  ;;  %7215 = vmatprep.mubr.f32.mxu1 %v3039_v42 }
 0x3e7   : > { %7395 = vmatpush3.bf16.msra.mxu0 %v7392_v20  ;;  %7419 = vmatpush3.bf16.msra.mxu1 %v7416_v21  ;;  %v4055_v20 = vsub.s32 0, %v4054_v19  ;;  %v4051_v21 = vpop.permute.xlu1 %4050  ;;  %v4400_v19 = vld [vmem:[%s8524_s20 + $0x10] sm:$0xff] }
 0x3e8   : > { %7397 = vmatprep.subr.bf16.mxu0 %v7396_v22  ;;  %7421 = vmatprep.subr.bf16.mxu1 %v7420_v23 }
 0x3ed   : > { %7174 = vmatmul.mubr.f32.vlgmr.msra.gmra.mrb[2].mxu0 %v3049_v36  ;;  %7216 = vmatmul.mubr.f32.vlgmr.msra.gmra.mrb[14].mxu1 %v3049_v36 }
 0x3ee   : > { %7180 = vmatprep.mubr.f32.mxu0 %v3040_v44  ;;  %7222 = vmatprep.mubr.f32.mxu1 %v3040_v44  ;;  %v5014_v44 = vld [vmem:[%s8526_s22 + $0x10] sm:$0xff] }
 0x3ef   : > { %7399 = vmatpush3.bf16.msra.mxu0 %v7396_v22  ;;  %7423 = vmatpush3.bf16.msra.mxu1 %v7420_v23  ;;  %v4056_v22 = vrot.slane %v4051_v21, %v4055_v20  ;;  %v4406_v20 = vsel %vm1965_vm2, %v4399_v18, 0  ;;  %v4409_v21 = vsel %vm1965_vm2, %v4400_v19, 0 }
 0x3f0   : > { %7401 = vmatprep.subr.bf16.mxu0 %v8146_v61  ;;  %7425 = vmatprep.subr.bf16.mxu1 %v8148_v0 }
 0x3f5   : > { %7181 = vmatmul.mubr.f32.vlgmr.msra.gmra.mrb[2].mxu0 %v3050_v43  ;;  %7223 = vmatmul.mubr.f32.vlgmr.msra.gmra.mrb[14].mxu1 %v3050_v43  ;;  %v5012_v43 = vld [vmem:[%s8526_s22] sm:$0xff] }
 0x3f6   : > { %7187 = vmatprep.mubr.f32.mxu0 %v3041_v46  ;;  %7229 = vmatprep.mubr.f32.mxu1 %v3041_v46  ;;  %v5025_v46 = vand.u32 4294901760, %v5014_v44 }
 0x3f7   : > { %7403 = vmatpush3.bf16.msra.mxu0 %v8146_v61  ;;  %7427 = vmatpush3.bf16.msra.mxu1 %v8148_v0 }
 0x3f8   : > { %7405 = vmatprep.subr.bf16.mxu0 %v8154_v24  ;;  %7429 = vmatprep.subr.bf16.mxu1 %v8156_v26 }
 0x3fd   : > { %7188 = vmatmul.mubr.f32.vlgmr.msra.gmra.mrb[2].mxu0 %v3051_v45  ;;  %7230 = vmatmul.mubr.f32.vlgmr.msra.gmra.mrb[14].mxu1 %v3051_v45  ;;  %v5021_v45 = vand.u32 4294901760, %v5012_v43 }
 0x3fe   : > { %7194 = vmatprep.mubr.f32.mxu0 %v3039_v42  ;;  %7236 = vmatprep.mubr.f32.mxu1 %v3039_v42 }
 0x3ff   : > { %7407 = vmatpush3.bf16.msra.mxu0 %v8154_v24  ;;  %7431 = vmatpush3.bf16.msra.mxu1 %v8156_v26  ;;  %v8266_v51 = vpack.c.bf16 %v5025_v46, %v5021_v45 }
 0x400   : > { %7409 = vmatprep.subr.bf16.mxu0 %v8146_v61  ;;  %7433 = vmatprep.subr.bf16.mxu1 %v8148_v0 }
 0x405   : > { %7195 = vmatmul.mubr.f32.vlgmr.msra.gmra.mrb[2].mxu0 %v3049_v36  ;;  %7237 = vmatmul.mubr.f32.vlgmr.msra.gmra.mrb[14].mxu1 %v3049_v36 }
 0x406   : > { %7201 = vmatprep.mubr.f32.mxu0 %v3039_v42  ;;  %7243 = vmatprep.mubr.f32.mxu1 %v3039_v42 }
 0x407   : > { %7411 = vmatpush3.bf16.msra.mxu0 %v8146_v61  ;;  %7435 = vmatpush3.bf16.msra.mxu1 %v8148_v0 }
 0x408   : > { %7436 = vmatprep.subr.bf16.mxu0 %v7699_v38  ;;  %7263 = vmatprep.subr.mxu1 %v7701_v41  ;;  %v4001_v38 = vmul.f32 %v8183_v33, %v3998_v55  ;;  %v4486_v33 = vsub.f32 %v8238_v31, %v8241_v32  ;;  %v8270_v55 = vsub.f32 %v5014_v44, %v5025_v46  ;;  %v4317_v46 = vpop.permute.xlu1 %4316 }
 0x40a   : > { %v8245_v34 = vand.u32 4294901760, %v4486_v33  ;;  %v5119_v2 = vand.u32 4294901760, %v8270_v55 }
 0x40d   : > { %7202 = vmatmul.mubr.f32.vlgmr.msra.gmra.mrb[2].mxu0 %v3049_v36  ;;  %7244 = vmatmul.mubr.f32.vlgmr.msra.gmra.mrb[14].mxu1 %v3049_v36  ;;  %v5015_v36 = vld [vmem:[%s8526_s22 + $0x18] sm:$0xff] }
 0x40e   : > { %7250 = vmatprep.mubr.msk.f32.mxu0 %vm7700_vm0, %v7701_v41  ;;  %7265 = vmatprep.mubr.msk.f32.mxu1 %vm7700_vm0, %v7701_v41  ;;  %v5023_v42 = vand.u32 4294901760, %v5015_v36 }
 0x410   : > { %v8260_v47 = vpack.c.bf16 %v5023_v42, %v5019_v37  ;;  %v8264_v50 = vsub.f32 %v5015_v36, %v5023_v42 }
 0x4e0   : > { %v7203_v3 = vpop.f32.mrb[2].mxu0  ;;  %v7245_v5 = vpop.f32.mrb[14].mxu1 }
 0x4e1   : > { %v3991_v7 = vmul.f32 %v7203_v3, %v3988_v52  ;;  %v3464_v10 = vpop.f32.mrb[3].mxu0  ;;  %v3968_v11 = vpop.f32.mrb[15].mxu1  ;;  %v4013_v58 = vmul.f32 %v7245_v5, %v4010_v59  ;;  %v8268_v52 = vsub.f32 %v5012_v43, %v5021_v45 }
 0x4e2   : > { %v3990_v53 = vmul.f32 %v3983_v60, %v3464_v10  ;;  %v4012_v48 = vmul.f32 %v4006_v56, %v3968_v11  ;;  %v5101_v56 = vand.u32 4294901760, %v8262_v49  ;;  %v5113_v60 = vand.u32 4294901760, %v8264_v50 }
 0x4e3   : > { %v4003_v61 = vadd.f32 %v4001_v38, %v3991_v7  ;;  %v5120_v7 = vsub.f32 %v8270_v55, %v5119_v2 }
 0x4e4   : > { %v4002_v63 = vadd.f32 %v4000_v57, %v3990_v53  ;;  %v5102_v3 = vsub.f32 %v8262_v49, %v5101_v56  ;;  %v5114_v5 = vsub.f32 %v8264_v50, %v5113_v60 }
 0x4e5   : > { %v4015_v0 = vadd.f32 %v4013_v58, %v4003_v61  ;;  %v7448_v61 = vpack.c.bf16 %v8264_v50, %v8262_v49  ;;  %v7450_v58 = vpack.c.bf16 %v8270_v55, %v8268_v52  ;;  %v5511_v49 = vld [vmem:[%s8527_s23 + $0x8] sm:$0xff]  ;;  %v5513_v50 = vld [vmem:[%s8527_s23 + $0x18] sm:$0xff] }
 0x4e6   : > { %v4014_v1 = vadd.f32 %v4012_v48, %v4002_v63  ;;  %v5103_v10 = vand.u32 4294901760, %v5102_v3  ;;  %v5115_v11 = vand.u32 4294901760, %v5114_v5  ;;  %v8288_v63 = vpack.c.bf16 %v5113_v60, %v5101_v56 }
 0x4e7   : > { %v4029_v4 = vmul.f32 %v4026_v54, %v4015_v0  ;;  %v5121_v54 = vand.u32 4294901760, %v5120_v7  ;;  %v4231_v0 = vpop.permute.xlu0 %4230  ;;  %v5521_v55 = vand.u32 4294901760, %v5513_v50 }
 0x4e8   : > { %v4028_v8 = vmul.f32 %v4021_v62, %v4014_v1  ;;  %v5107_v62 = vand.u32 4294901760, %v8268_v52  ;;  %v7444_v59 = vpack.c.bf16 %v5115_v11, %v5103_v10 }
 0x4e9   : > { %v4043_v9 = vadd.f32 %v4040_v6, %v4029_v4 }
 0x4ea   : > { %v4042_v13 = vadd.f32 %v4035_v12, %v4028_v8  ;;  %v5108_v38 = vsub.f32 %v8268_v52, %v5107_v62  ;;  %v8290_v48 = vpack.c.bf16 %v5119_v2, %v5107_v62  ;;  %v5517_v52 = vand.u32 4294901760, %v5511_v49 }
 0x4eb   : > { %v4045_v14 = vmax.f32 %v4043_v9, 0.0  ;;  %v4140_v1 = vpop.permute.xlu0 %4139 }
 0x4ec   : > { %v4044_v15 = vmax.f32 %v4042_v13, 0.0  ;;  %v5109_v57 = vand.u32 4294901760, %v5108_v38 }
 0x4ee   : > { %v7437_v16 = vpack.c.bf16 %v4045_v14, %v4044_v15  ;;  %v8282_v53 = vpack.c.bf16 %v5121_v54, %v5109_v57 }
 0x4f0   : > { %7439 = vmatpush3.bf16.msk.msra.mxu0 %vm7438_vm6, %v7437_v16 }
 0x4f1   : > { %7253 = vmatprep.subr.mxu0 %v7701_v41 }
 0x4f3   : > { %7251 = vmatmul.mubr.msk.f32.vlgmr.msra.gmra.mrb[4].mxu0 %vm4057_vm7, %v4046_v17 }
 0x4f4   : > { %7255 = vmatprep.mubr.msk.f32.mxu0 %vm7700_vm0, %v7701_v41 }
 0x5c6   : > { %v4130_v23 = vpop.f32.mrb[4].mxu0 }
 0x5c7   : > { %v4131_v24 = vadd.f32 %v4130_v23, %v4056_v22  ;;  %v7252_v26 = vpop.f32.mrb[5].mxu0  ;;  %v4401_v22 = vld [vmem:[%s8524_s20 + $0x18] sm:$0xff]  ;;  %v8303_v23 = vand.u32 4294901760, %v4406_v20 }
 0x5c8   : > { %v8305_v26 = vand.u32 4294901760, %v4409_v21 }
 0x5c9   : > { %v4134_v27 = vmax.f32 %v4131_v24, 0.0 }
 0x5ca   : > { %v8314_v30 = vsub.f32 %v4409_v21, %v8305_v26 }
 0x5cb   : > { %7254 = vmatpush3.msk.msra.mxu0 %vm4146_vm8, %v4134_v27  ;;  %7264 = vmatpush3.msk.msra.mxu1 %vm4146_vm8, %v4134_v27 }
 0x5cc   : > { %7256 = vmatmul.mubr.msk.f32.vlgmr.msra.gmra.mrb[6].mxu0 %vm4142_vm9, %v4135_v28  ;;  %7258 = vmatprep.subr.mxu0 %v7701_v41  ;;  %v8323_v37 = vand.u32 4294901760, %v8314_v30 }
 0x5cd   : > { %7266 = vmatmul.mubr.msk.f32.vlgmr.msra.gmra.mrb[16].mxu1 %vm4142_vm9, %v4312_v29  ;;  %7259 = vmatpush3.msk.msra.mxu0 %vm4146_vm8, %v4134_v27  ;;  %v4412_v27 = vsel %vm1965_vm2, %v4401_v22, 0  ;;  %v8309_v29 = vsub.f32 %v4406_v20, %v8303_v23 }
 0x5ce   : > { %7260 = vmatprep.mubr.msk.f32.mxu0 %vm7700_vm0, %v7701_v41  ;;  %5087 = vmatprep.mubr.f32.mxu1 %v7701_v41  ;;  %v4506_v44 = vsub.f32 %v8314_v30, %v8323_v37 }
 0x5cf   : > { %7441 = vmatprep.subr.bf16.mxu1 %v8260_v47  ;;  %v8317_v35 = vand.u32 4294901760, %v8309_v29 }
 0x5d0   : > { %7261 = vmatmul.mubr.msk.f32.vlgmr.msra.gmra.mrb[8].mxu0 %vm4142_vm9, %v4226_v39  ;;  %7443 = vmatpush1.bf16.msra.mxu1 %v8266_v51  ;;  %v8311_v39 = vand.u32 4294901760, %v4412_v27  ;;  %v8339_v5 = vand.u32 4294901760, %v4506_v44 }
 0x5d1   : > { %7270 = vmatprep.mubr.f32.mxu0 %v8245_v34  ;;  %7445 = vmatprep.subr.bf16.mxu1 %v7444_v59  ;;  %v4496_v42 = vsub.f32 %v8309_v29, %v8317_v35 }
 0x5d2   : > { %v8320_v36 = vsub.f32 %v4412_v27, %v8311_v39 }
 0x5d3   : > { %v8335_v2 = vand.u32 4294901760, %v4496_v42 }
 0x5d4   : > { %v8328_v43 = vand.u32 4294901760, %v8320_v36 }
 0x5d6   : > { %v4516_v3 = vsub.f32 %v8320_v36, %v8328_v43 }
 0x5d8   : > { %v8346_v57 = vand.u32 4294901760, %v4516_v3 }
 0x69f   : > { %v4216_v4 = vpop.f32.mrb[6].mxu0 }
 0x6a0   : > { %v4217_v6 = vadd.f32 %v4216_v4, %v4140_v1  ;;  %v4388_v8 = vpop.f32.mrb[16].mxu1  ;;  %v7257_v9 = vpop.f32.mrb[7].mxu0 }
 0x6a1   : > { %v7267_v12 = vpop.f32.mrb[17].mxu1  ;;  %v4389_v60 = vadd.f32 %v4388_v8, %v4317_v46 }
 0x6a2   : > { %v6748_v13 = vmul.f32 -1.442695, %v4217_v6 }
 0x6a3   : > { %v4302_v14 = vpop.f32.mrb[8].mxu0  ;;  %v6754_v10 = vmul.f32 -1.442695, %v4389_v60 }
 0x6a4   : > { %7673 = vpow2.f32 %v6748_v13  ;;  %v4303_v15 = vadd.f32 %v4302_v14, %v4231_v0  ;;  %v7262_v16 = vpop.f32.mrb[9].mxu0 }
 0x6a5   : > { %v5598_v16 = vsub.f32 %v5511_v49, %v5517_v52  ;;  %v4994_v49 = vld [vmem:[%s8525_s21 + $0x10] sm:$0xff] }
 0x6a6   : > { %v6751_v17 = vmul.f32 -1.442695, %v4303_v15 }
 0x6a7   : > { %v5599_v21 = vand.u32 4294901760, %v5598_v16 }
 0x6a8   : > { %7675 = vpow2.f32 %v6751_v17  ;;  %v5610_v17 = vsub.f32 %v5513_v50, %v5521_v55 }
 0x6aa   : > { %v5611_v22 = vand.u32 4294901760, %v5610_v17 }
 0x6ac   : > { %v5612_v42 = vsub.f32 %v5610_v17, %v5611_v22 }
 0x6ae   : > { %v7674_v24 = vpop.eup %7673  ;;  %v5613_v46 = vand.u32 4294901760, %v5612_v42 }
 0x6af   : > { %v4223_v28 = vadd.f32 1.0, %v7674_v24 }
 0x6b1   : > { %7677 = vrcp.f32 %v4223_v28  ;;  %v7464_v28 = vpack.c.bf16 %v5521_v55, %v5517_v52 }
 0x6b2   : > { %v7676_v40 = vpop.eup %7675 }
 0x6b3   : > { %v4309_v33 = vadd.f32 1.0, %v7676_v40 }
 0x6b5   : > { %7679 = vrcp.f32 %v4309_v33  ;;  %v5600_v33 = vsub.f32 %v5598_v16, %v5599_v21 }
 0x6b6   : > { %7681 = vpow2.f32 %v6754_v10  ;;  %v7472_v10 = vpack.c.bf16 %v5610_v17, %v5598_v16 }
 0x6bb   : > { %v7678_v45 = vpop.eup %7677 }
 0x6bc   : > { %v4415_v56 = vsel %vm1972_vm3, %v7678_v45, 0  ;;  %v5601_v45 = vand.u32 4294901760, %v5600_v33 }
 0x6bd   : > { %v8333_v62 = vand.u32 4294901760, %v4415_v56 }
 0x6bf   : > { %v7680_v38 = vpop.eup %7679  ;;  %7268 = vmatprep.subr.mxu0 %v8333_v62  ;;  %v4525_v7 = vsub.f32 %v4415_v56, %v8333_v62 }
 0x6c0   : > { %7269 = vmatpush3.msra.mxu0 %v8333_v62  ;;  %v5017_v11 = vsel %vm2965_vm4, %v7680_v38, 0  ;;  %v7682_v12 = vpop.eup %7681  ;;  %v7468_v38 = vpack.c.bf16 %v5613_v46, %v5601_v45 }
 0x6c1   : > { %7271 = vmatmul.mubr.f32.vlgmr.msra.gmra.mrb[10].mxu0 %v8335_v2  ;;  %v4526_v54 = vand.u32 4294901760, %v4525_v7  ;;  %v8348_v59 = vand.u32 4294901760, %v5017_v11  ;;  %v4395_v13 = vadd.f32 1.0, %v7682_v12 }
 0x6c2   : > { %7273 = vmatprep.mubr.f32.mxu0 %v8339_v5 }
 0x6c3   : > { %v4527_v0 = vsub.f32 %v4525_v7, %v4526_v54  ;;  %v5089_v1 = vsub.f32 %v5017_v11, %v8348_v59  ;;  %7683 = vrcp.f32 %v4395_v13 }
 0x6c5   : > { %7274 = vmatmul.mubr.f32.gmra.mrb[12].mxu0 %v8346_v57  ;;  %v4528_v4 = vand.u32 4294901760, %v4527_v0  ;;  %v5090_v6 = vand.u32 4294901760, %v5089_v1 }
 0x6c6   : > { %7278 = vmatprep.mubr.f32.mxu0 %v8235_v25 }
 0x6c7   : > { %7276 = vmatprep.subr.mxu0 %v4528_v4  ;;  %v5091_v8 = vsub.f32 %v5089_v1, %v5090_v6 }
 0x6c8   : > { %7277 = vmatpush3.msra.mxu0 %v4528_v4 }
 0x6c9   : > { %7279 = vmatmul.mubr.f32.vlgmr.msra.gmra.mrb[10].mxu0 %v8303_v23  ;;  %7284 = vmatprep.subr.mxu0 %v4525_v7  ;;  %v5092_v9 = vand.u32 4294901760, %v5091_v8  ;;  %v4992_v8 = vld [vmem:[%s8525_s21] sm:$0xff] }
 0x6ca   : > { %7285 = vmatpush3.msra.mxu0 %v4525_v7  ;;  %7281 = vmatprep.mubr.f32.mxu0 %v8305_v26 }
 0x6cb   : > { %7292 = vmatprep.subr.mxu0 %v8333_v62  ;;  %5093 = vmatmul.mubr.f32.vlgmr.msra.gmra.mrb[18].mxu1 %v5092_v9  ;;  %v4995_v9 = vld [vmem:[%s8525_s21 + $0x18] sm:$0xff] }
 0x6cc   : > { %7447 = vmatpush1.bf16.msra.mxu1 %v8282_v53  ;;  %5183 = vmatprep.mubr.f32.mxu1 %v7701_v41  ;;  %v5510_v53 = vld [vmem:[%s8527_s23] sm:$0xff] }
 0x6cd   : > { %7282 = vmatmul.mubr.f32.gmra.mrb[12].mxu0 %v8311_v39  ;;  %7449 = vmatprep.subr.bf16.mxu1 %v7448_v61  ;;  %v5512_v61 = vld [vmem:[%s8527_s23 + $0x10] sm:$0xff]  ;;  %v5519_v14 = vand.u32 4294901760, %v5510_v53 }
 0x6ce   : > { %7286 = vmatprep.mubr.f32.mxu0 %v8238_v31  ;;  %v5523_v15 = vand.u32 4294901760, %v5512_v61 }
 0x6cf   : > { %v5604_v18 = vsub.f32 %v5510_v53, %v5519_v14 }
 0x6d0   : > { %v5616_v19 = vsub.f32 %v5512_v61, %v5523_v15  ;;  %v7466_v56 = vpack.c.bf16 %v5523_v15, %v5519_v14 }
 0x6d1   : > { %7287 = vmatmul.mubr.f32.vlgmr.msra.gmra.mrb[10].mxu0 %v8309_v29  ;;  %v5605_v24 = vand.u32 4294901760, %v5604_v18 }
 0x6d2   : > { %7293 = vmatpush3.msra.mxu0 %v8333_v62  ;;  %7289 = vmatprep.mubr.f32.mxu0 %v8314_v30  ;;  %v5617_v27 = vand.u32 4294901760, %v5616_v19  ;;  %v7474_v11 = vpack.c.bf16 %v5616_v19, %v5604_v18 }
 0x6d3   : > { %7300 = vmatprep.subr.mxu0 %v4526_v54  ;;  %5185 = vmatmul.mubr.f32.vlgmr.msra.gmra.mrb[18].mxu1 %v8348_v59 }
 0x6d4   : > { %7451 = vmatpush1.bf16.msra.mxu1 %v7450_v58  ;;  %5263 = vmatprep.mubr.f32.mxu1 %v7701_v41  ;;  %v7684_v58 = vpop.eup %7683 }
 0x6d5   : > { %7290 = vmatmul.mubr.f32.gmra.mrb[12].mxu0 %v8320_v36  ;;  %7453 = vmatprep.subr.bf16.mxu1 %v8260_v47 }
 0x6d6   : > { %7294 = vmatprep.mubr.f32.mxu0 %v8241_v32 }
 0x6d9   : > { %7295 = vmatmul.mubr.f32.vlgmr.msra.gmra.mrb[10].mxu0 %v8317_v35 }
 0x6da   : > { %7301 = vmatpush3.msra.mxu0 %v4526_v54  ;;  %7297 = vmatprep.mubr.f32.mxu0 %v8323_v37  ;;  %v7480_v54 = vpack.c.bf16 %v5611_v22, %v5599_v21 }
 0x6db   : > { %7308 = vmatprep.subr.mxu0 %v8333_v62  ;;  %5266 = vmatmul.mubr.f32.vlgmr.msra.gmra.mrb[18].mxu1 %v5089_v1 }
 0x6dc   : > { %7455 = vmatpush1.bf16.msra.mxu1 %v8266_v51  ;;  %5340 = vmatprep.mubr.f32.mxu1 %v7701_v41 }
 0x6dd   : > { %7298 = vmatmul.mubr.f32.gmra.mrb[12].mxu0 %v8328_v43  ;;  %7457 = vmatprep.subr.bf16.mxu1 %v8288_v63  ;;  %v5515_v63 = vsel %vm2965_vm4, %v7684_v58, 0 }
 0x6de   : > { %7302 = vmatprep.mubr.f32.mxu0 %v8235_v25  ;;  %v5586_v20 = vand.u32 4294901760, %v5515_v63 }
 0x6e0   : > { %v5587_v40 = vsub.f32 %v5515_v63, %v5586_v20 }
 0x6e1   : > { %7303 = vmatmul.mubr.f32.vlgmr.msra.gmra.mrb[10].mxu0 %v8303_v23 }
 0x6e2   : > { %7309 = vmatpush3.msra.mxu0 %v8333_v62  ;;  %7305 = vmatprep.mubr.f32.mxu0 %v8305_v26  ;;  %v5588_v44 = vand.u32 4294901760, %v5587_v40 }
 0x6e3   : > { %5344 = vmatmul.mubr.f32.vlgmr.msra.gmra.mrb[18].mxu1 %v5090_v6  ;;  %v4993_v6 = vld [vmem:[%s8525_s21 + $0x8] sm:$0xff] }
 0x6e4   : > { %7459 = vmatpush1.bf16.msra.mxu1 %v8290_v48  ;;  %5426 = vmatprep.mubr.f32.mxu1 %v7701_v41  ;;  %v5618_v48 = vsub.f32 %v5616_v19, %v5617_v27  ;;  %v5589_v3 = vsub.f32 %v5587_v40, %v5588_v44 }
 0x6e5   : > { %7461 = vmatprep.subr.bf16.mxu1 %v8260_v47  ;;  %7306 = vmatmul.mubr.f32.gmra.mrb[12].mxu0 %v8311_v39  ;;  %v5606_v47 = vsub.f32 %v5604_v18, %v5605_v24 }
 0x6e6   : > { %7310 = vmatprep.mubr.f32.mxu0 %v8235_v25  ;;  %v5619_v62 = vand.u32 4294901760, %v5618_v48  ;;  %v5590_v7 = vand.u32 4294901760, %v5589_v3 }
 0x6e7   : > { %v5607_v60 = vand.u32 4294901760, %v5606_v47 }
 0x6e9   : > { %7311 = vmatmul.mubr.f32.vlgmr.msra.gmra.mrb[10].mxu0 %v8303_v23 }
 0x6ea   : > { %7313 = vmatprep.mubr.f32.mxu0 %v8305_v26 }
 0x6eb   : > { %5428 = vmatmul.mubr.f32.vlgmr.msra.gmra.mrb[18].mxu1 %v8348_v59 }
 0x6ec   : > { %7463 = vmatpush1.bf16.msra.mxu1 %v8266_v51  ;;  %5502 = vmatprep.mubr.f32.mxu1 %v7701_v41  ;;  %v7470_v51 = vpack.c.bf16 %v5619_v62, %v5607_v60 }
 0x6ed   : > { %7465 = vmatprep.subr.bf16.mxu1 %v7464_v28  ;;  %7314 = vmatmul.mubr.f32.gmra.mrb[12].mxu0 %v8311_v39 }
 0x6ee   : > { %6082 = vmatprep.mubr.f32.mxu0 %v7701_v41 }
 0x6f3   : > { %5504 = vmatmul.mubr.f32.vlgmr.msra.gmra.mrb[18].mxu1 %v8348_v59  ;;  %v7482_v59 = vpack.c.bf16 %v5617_v27, %v5605_v24 }
 0x6f4   : > { %7467 = vmatpush1.bf16.msra.mxu1 %v7466_v56  ;;  %5585 = vmatprep.mubr.f32.mxu1 %v7701_v41 }
 0x6f5   : > { %7469 = vmatprep.subr.bf16.mxu1 %v7468_v38 }
 0x6f7   : > { %5591 = vmatmul.mubr.f32.vlgmr.msra.gmra.mrb[20].mxu1 %v5590_v7 }
 0x6f8   : > { %7471 = vmatpush1.bf16.msra.mxu1 %v7470_v51  ;;  %5681 = vmatprep.mubr.f32.mxu1 %v7701_v41  ;;  %v7688_v51 = vld [vmem:[%s7874_s4 + $0x18] sm:$0xff] }
 0x6f9   : > { %7473 = vmatprep.subr.bf16.mxu1 %v7472_v10  ;;  %v6634_v7 = vunpack.c.l.bf16 %v7688_v51 }
 0x6ff   : > { %5683 = vmatmul.mubr.f32.vlgmr.msra.gmra.mrb[20].mxu1 %v5586_v20 }
 0x700   : > { %7475 = vmatpush1.bf16.msra.mxu1 %v7474_v11  ;;  %5761 = vmatprep.mubr.f32.mxu1 %v7701_v41  ;;  %v6635_v11 = vunpack.c.h.bf16 %v7688_v51 }
 0x701   : > { %7477 = vmatprep.subr.bf16.mxu1 %v7464_v28 }
 0x707   : > { %5764 = vmatmul.mubr.f32.vlgmr.msra.gmra.mrb[20].mxu1 %v5587_v40 }
 0x708   : > { %7479 = vmatpush1.bf16.msra.mxu1 %v7466_v56  ;;  %5838 = vmatprep.mubr.f32.mxu1 %v7701_v41 }
 0x709   : > { %7481 = vmatprep.subr.bf16.mxu1 %v7480_v54 }
 0x70f   : > { %5842 = vmatmul.mubr.f32.vlgmr.msra.gmra.mrb[20].mxu1 %v5588_v44 }
 0x710   : > { %7483 = vmatpush1.bf16.msra.mxu1 %v7482_v59  ;;  %5924 = vmatprep.mubr.f32.mxu1 %v7701_v41 }
 0x711   : > { %7485 = vmatprep.subr.bf16.mxu1 %v7464_v28 }
 0x717   : > { %5926 = vmatmul.mubr.f32.vlgmr.msra.gmra.mrb[20].mxu1 %v5586_v20 }
 0x718   : > { %7487 = vmatpush1.bf16.msra.mxu1 %v7466_v56  ;;  %6000 = vmatprep.mubr.f32.mxu1 %v7701_v41 }
 0x71f   : > { %6002 = vmatmul.mubr.f32.vlgmr.msra.gmra.mrb[20].mxu1 %v5586_v20 }
 0x7bc   : > { %v7312_v4 = vpop.f32.mrb[10].mxu0 }
 0x7bd   : > { %v4997_v12 = vmul.f32 %v7312_v4, %v4993_v6  ;;  %v4970_v13 = vpop.f32.mrb[11].mxu0 }
 0x7be   : > { %v4996_v50 = vmul.f32 %v4992_v8, %v4970_v13 }
 0x7bf   : > { %v5003_v53 = vsel %vm2965_vm4, %v4997_v12, 0.0 }
 0x7c0   : > { %v7315_v52 = vpop.f32.mrb[12].mxu0  ;;  %5004 = vadd.xlane.f32.xlu0 %v5003_v53  ;;  %v5000_v58 = vsel %vm2965_vm4, %v4996_v50, 0.0 }
 0x7c1   : > { %v4999_v55 = vmul.f32 %v7315_v52, %v4995_v9  ;;  %v4982_v61 = vpop.f32.mrb[13].mxu0  ;;  %5001 = vadd.xlane.f32.xlu1 %v5000_v58 }
 0x7c2   : > { %v4998_v14 = vmul.f32 %v4994_v49, %v4982_v61 }
 0x7c3   : > { %v5009_v15 = vsel %vm2965_vm4, %v4999_v55, 0.0 }
 0x7c4   : > { %v5006_v16 = vsel %vm2965_vm4, %v4998_v14, 0.0 }
 0x7c5   : > { %5007 = vadd.xlane.f32.xlu0 %v5006_v16  ;;  %5010 = vadd.xlane.f32.xlu1 %v5009_v15 }
 0x7c6   : > { %v5505_v0 = vpop.f32.mrb[18].mxu1 }
 0x7c7   : > { %v5507_v1 = vpop.f32.mrb[19].mxu1 }
 0x7f2   : > { %v6003_v17 = vpop.f32.mrb[20].mxu1 }
 0x7f3   : > { %v6008_v63 = vmul.f32 %v6003_v17, %v5505_v0  ;;  %v6005_v18 = vpop.f32.mrb[21].mxu1 }
 0x7f4   : > { %v6009_v19 = vmul.f32 %v6005_v18, %v5507_v1 }
 0x7f5   : > { %v6011_v20 = vsel %vm1972_vm3, %v6008_v63, 0 }
 0x7f6   : > { %v6018_v21 = vand.u32 4294901760, %v6011_v20  ;;  %v6014_v22 = vsel %vm1972_vm3, %v6009_v19, 0 }
 0x7f7   : > { %v6016_v24 = vand.u32 4294901760, %v6014_v22 }
 0x7f8   : > { %v6134_v27 = vsub.f32 %v6011_v20, %v6018_v21 }
 0x7f9   : > { %v6128_v28 = vsub.f32 %v6014_v22, %v6016_v24  ;;  %6017 = vmatprep.subr.mxu0 %v6016_v24 }
 0x7fa   : > { %v6135_v40 = vand.u32 4294901760, %v6134_v27  ;;  %6019 = vmatpush1.msra.mxu0 %v6018_v21 }
 0x7fb   : > { %6088 = vmatmul.mubr.f32.vlgmr.msra.gmra.mrb[14].mxu0 %v8245_v34  ;;  %v6129_v33 = vand.u32 4294901760, %v6128_v28 }
 0x7fc   : > { %6093 = vmatprep.mubr.f32.mxu0 %v7701_v41  ;;  %v6136_v42 = vsub.f32 %v6134_v27, %v6135_v40 }
 0x7fd   : > { %v6130_v47 = vsub.f32 %v6128_v28, %v6129_v33 }
 0x7fe   : > { %v6137_v44 = vand.u32 4294901760, %v6136_v42 }
 0x7ff   : > { %6099 = vmatmul.mubr.f32.gmra.mrb[16].mxu0 %v8335_v2  ;;  %v6131_v48 = vand.u32 4294901760, %v6130_v47 }
 0x800   : > { %6104 = vmatprep.mubr.f32.mxu0 %v7701_v41 }
 0x801   : > { %6132 = vmatprep.subr.mxu0 %v6131_v48 }
 0x802   : > { %6138 = vmatpush1.msra.mxu0 %v6137_v44 }
 0x803   : > { %6110 = vmatmul.mubr.f32.gmra.mrb[18].mxu0 %v8339_v5  ;;  %6232 = vmatprep.subr.mxu0 %v6128_v28  ;;  %v7687_v5 = vld [vmem:[%s7874_s4 + $0x10] sm:$0xff] }
 0x804   : > { %6115 = vmatprep.mubr.f32.mxu0 %v7701_v41  ;;  %v6633_v46 = vunpack.c.h.bf16 %v7687_v5 }
 0x807   : > { %6121 = vmatmul.mubr.f32.gmra.mrb[20].mxu0 %v8346_v57  ;;  %v6632_v57 = vunpack.c.l.bf16 %v7687_v5 }
 0x808   : > { %6201 = vmatprep.mubr.f32.mxu0 %v7701_v41 }
 0x80b   : > { %6203 = vmatmul.mubr.f32.vlgmr.msra.gmra.mrb[14].mxu0 %v8235_v25 }
 0x80c   : > { %6235 = vmatpush1.msra.mxu0 %v6134_v27  ;;  %6208 = vmatprep.mubr.f32.mxu0 %v7701_v41 }
 0x80d   : > { %6332 = vmatprep.subr.mxu0 %v6016_v24 }
 0x80f   : > { %6210 = vmatmul.mubr.f32.gmra.mrb[16].mxu0 %v8303_v23 }
 0x810   : > { %6215 = vmatprep.mubr.f32.mxu0 %v7701_v41 }
 0x813   : > { %6217 = vmatmul.mubr.f32.gmra.mrb[18].mxu0 %v8305_v26 }
 0x814   : > { %6222 = vmatprep.mubr.f32.mxu0 %v7701_v41 }
 0x817   : > { %6224 = vmatmul.mubr.f32.gmra.mrb[20].mxu0 %v8311_v39 }
 0x818   : > { %6298 = vmatprep.mubr.f32.mxu0 %v7701_v41 }
 0x81b   : > { %6301 = vmatmul.mubr.f32.vlgmr.msra.gmra.mrb[14].mxu0 %v8238_v31  ;;  %v7685_v31 = vld [vmem:[%s7874_s4] sm:$0xff] }
 0x81c   : > { %6334 = vmatpush1.msra.mxu0 %v6018_v21  ;;  %6306 = vmatprep.mubr.f32.mxu0 %v7701_v41  ;;  %v6629_v34 = vunpack.c.h.bf16 %v7685_v31 }
 0x81d   : > { %6437 = vmatprep.subr.mxu0 %v6129_v33 }
 0x81f   : > { %6309 = vmatmul.mubr.f32.gmra.mrb[16].mxu0 %v8309_v29 }
 0x820   : > { %6314 = vmatprep.mubr.f32.mxu0 %v7701_v41 }
 0x823   : > { %6317 = vmatmul.mubr.f32.gmra.mrb[18].mxu0 %v8314_v30 }
 0x824   : > { %6322 = vmatprep.mubr.f32.mxu0 %v7701_v41 }
 0x827   : > { %6325 = vmatmul.mubr.f32.gmra.mrb[20].mxu0 %v8320_v36 }
 0x828   : > { %6397 = vmatprep.mubr.f32.mxu0 %v7701_v41 }
 0x82b   : > { %6401 = vmatmul.mubr.f32.vlgmr.msra.gmra.mrb[14].mxu0 %v8241_v32  ;;  %v6628_v32 = vunpack.c.l.bf16 %v7685_v31 }
 0x82c   : > { %6441 = vmatpush1.msra.mxu0 %v6135_v40  ;;  %6406 = vmatprep.mubr.f32.mxu0 %v7701_v41 }
 0x82d   : > { %6534 = vmatprep.subr.mxu0 %v6016_v24 }
 0x82f   : > { %6410 = vmatmul.mubr.f32.gmra.mrb[16].mxu0 %v8317_v35 }
 0x830   : > { %6415 = vmatprep.mubr.f32.mxu0 %v7701_v41 }
 0x833   : > { %6419 = vmatmul.mubr.f32.gmra.mrb[18].mxu0 %v8323_v37 }
 0x834   : > { %6424 = vmatprep.mubr.f32.mxu0 %v7701_v41 }
 0x837   : > { %6428 = vmatmul.mubr.f32.gmra.mrb[20].mxu0 %v8328_v43 }
 0x838   : > { %6504 = vmatprep.mubr.f32.mxu0 %v7701_v41 }
 0x83b   : > { %6506 = vmatmul.mubr.f32.vlgmr.msra.gmra.mrb[14].mxu0 %v8235_v25 }
 0x83c   : > { %6536 = vmatpush1.msra.mxu0 %v6018_v21  ;;  %6511 = vmatprep.mubr.f32.mxu0 %v7701_v41 }
 0x83f   : > { %6513 = vmatmul.mubr.f32.gmra.mrb[16].mxu0 %v8303_v23 }
 0x840   : > { %6518 = vmatprep.mubr.f32.mxu0 %v7701_v41 }
 0x843   : > { %6520 = vmatmul.mubr.f32.gmra.mrb[18].mxu0 %v8305_v26 }
 0x844   : > { %6525 = vmatprep.mubr.f32.mxu0 %v7701_v41 }
 0x847   : > { %6527 = vmatmul.mubr.f32.gmra.mrb[20].mxu0 %v8311_v39 }
 0x848   : > { %6599 = vmatprep.mubr.f32.mxu0 %v7701_v41 }
 0x84b   : > { %6601 = vmatmul.mubr.f32.vlgmr.msra.gmra.mrb[14].mxu0 %v8235_v25  ;;  %v7686_v25 = vld [vmem:[%s7874_s4 + $0x8] sm:$0xff] }
 0x84c   : > { %6606 = vmatprep.mubr.f32.mxu0 %v7701_v41  ;;  %v6630_v35 = vunpack.c.l.bf16 %v7686_v25 }
 0x84d   : > { %v5005_v30 = vpop.xlane.xlu0 %5004 }
 0x84e   : > { %v5002_v29 = vpop.xlane.xlu1 %5001  ;;  %v6638_v2 = vmul.f32 %v6630_v35, %v5005_v30 }
 0x84f   : > { %6608 = vmatmul.mubr.f32.gmra.mrb[16].mxu0 %v8303_v23  ;;  %v6636_v36 = vmul.f32 %v6628_v32, %v5002_v29  ;;  %v6637_v23 = vmul.f32 %v6629_v34, %v5002_v29 }
 0x850   : > { %6613 = vmatprep.mubr.f32.mxu0 %v7701_v41 }
 0x852   : > { %v5008_v56 = vpop.xlane.xlu0 %5007  ;;  %v5011_v54 = vpop.xlane.xlu1 %5010 }
 0x853   : > { %6615 = vmatmul.mubr.f32.gmra.mrb[18].mxu0 %v8305_v26  ;;  %v6640_v10 = vmul.f32 %v6632_v57, %v5008_v56  ;;  %v6641_v59 = vmul.f32 %v6633_v46, %v5008_v56  ;;  %v6642_v8 = vmul.f32 %v6634_v7, %v5011_v54  ;;  %v6643_v9 = vmul.f32 %v6635_v11, %v5011_v54 }
 0x854   : > { %6620 = vmatprep.mubr.f32.mxu0 %v7701_v41  ;;  %v6631_v41 = vunpack.c.h.bf16 %v7686_v25 }
 0x856   : > { %v6639_v45 = vmul.f32 %v6631_v41, %v5005_v30 }
 0x857   : > { %6622 = vmatmul.mubr.f32.gmra.mrb[20].mxu0 %v8311_v39 }
 0x91e   : > { %v6602_v26 = vpop.f32.mrb[14].mxu0 }
 0x91f   : > { %v6644_v39 = vmul.f32 %v6636_v36, %v6602_v26  ;;  %v6604_v37 = vpop.f32.mrb[15].mxu0 }
 0x920   : > { %v6645_v43 = vmul.f32 %v6637_v23, %v6604_v37 }
 0x921   : > { %6652 = vst [vmem:[%s8489_s3] sm:$0xff] %v6644_v39 }
 0x922   : > { %6653 = vst [vmem:[%s8489_s3 + $0x8] sm:$0xff] %v6645_v43  ;;  %v6609_v60 = vpop.f32.mrb[16].mxu0 }
 0x923   : > { %v6646_v62 = vmul.f32 %v6638_v2, %v6609_v60  ;;  %v6611_v3 = vpop.f32.mrb[17].mxu0 }
 0x924   : > { %v6647_v38 = vmul.f32 %v6639_v45, %v6611_v3 }
 0x925   : > { %6654 = vst [vmem:[%s8489_s3 + $0x10] sm:$0xff] %v6646_v62 }
 0x926   : > { %6655 = vst [vmem:[%s8489_s3 + $0x18] sm:$0xff] %v6647_v38  ;;  %v6616_v0 = vpop.f32.mrb[18].mxu0 }
 0x927   : > { %v6648_v1 = vmul.f32 %v6640_v10, %v6616_v0  ;;  %v6618_v4 = vpop.f32.mrb[19].mxu0 }
 0x928   : > { %v6649_v6 = vmul.f32 %v6641_v59, %v6618_v4 }
 0x929   : > { %6656 = vst [vmem:[%s8489_s3 + $0x20] sm:$0xff] %v6648_v1 }
 0x92a   : > { %6657 = vst [vmem:[%s8489_s3 + $0x28] sm:$0xff] %v6649_v6  ;;  %v6623_v12 = vpop.f32.mrb[20].mxu0 }
 0x92b   : > { %v6650_v13 = vmul.f32 %v6642_v8, %v6623_v12  ;;  %v6625_v49 = vpop.f32.mrb[21].mxu0 }
 0x92c   : > { %v6651_v50 = vmul.f32 %v6643_v9, %v6625_v49 }
 0x92d   : > { %6658 = vst [vmem:[%s8489_s3 + $0x30] sm:$0xff] %v6650_v13 }
 0x92e   : > { %6659 = vst [vmem:[%s8489_s3 + $0x38] sm:$0xff] %v6651_v50 }
 0x92f PF: > { %s36_s27 = sadd.s32 1, %s7695_s27  }
 0x930   : > { %p33_p4 = scmp.ge.s32.totalorder %s36_s27, 4  }
 0x932   :  { %35 = sbr.rel (!%p33_p4) target bundleno = 10 (0xa), region = 146 }

</bundles_post_ra>
